<compile_context>
chip_gen: v7x
topology: tpu7x:2x2x1
jax: 0.10.0
libtpu: 0.0.40
codegen_flags: <defaults>
</compile_context>

<pallas_src>
import jax
import jax.numpy as jnp
from jax.experimental import pallas as pl
from jax.experimental.pallas import tpu as pltpu

# ---- module constants (match the PyTorch definition) ------------------------
ATOM_VOCABS = (100, 10, 10, 10, 10)   # atom / charge / chiral / aromatic / ring
NUM_IDX = 5
ATOM_BASES = tuple(int(sum(ATOM_VOCABS[:i])) for i in range(NUM_IDX))  # 0,100,110,120,130
ATOM_TOTAL = int(sum(ATOM_VOCABS))    # 140

BOND_VOCABS = (10, 10)
NUM_EIDX = 2
BOND_BASES = (0, 10)
BOND_TOTAL = 20


def _round_up(v, m):
    return (v + m - 1) // m * m


def _choose_tile(n, requested):
    """Single tile when the problem fits (grid is a serial loop on v5e/v6e);
    otherwise use the requested large tile to amortize per-step overhead."""
    requested = max(8, _round_up(requested, 8))
    if n <= requested:
        return max(8, _round_up(n, 8))
    return requested


# ---------------------------------------------------------------------------
# Kernels
# ---------------------------------------------------------------------------
def _node_kernel(x_ref, w_ref, o_ref):
    """node_embedding = Linear(embed_atom_chem(x)) as ONE matmul.

    LHS [TN, 142]: cols 0..139 fused one-hot over the five vocabularies,
    col 140 = passthrough feature x[:,5], col 141 = 1.0 (bias row of W_node).
    """
    x = x_ref[...]                                          # [TN, 6] f32
    tn = x.shape[0]
    kf = w_ref.shape[0]                                     # 142
    xi = x[:, :NUM_IDX].astype(jnp.int32)                   # [TN, 5]

    iota = jax.lax.broadcasted_iota(jnp.int32, (tn, kf), 1)
    # Disjoint vocab ranges -> OR of compares == sum of one-hots.
    mask = iota == (xi[:, 0:1] + ATOM_BASES[0])
    for i in range(1, NUM_IDX):
        mask = mask | (iota == (xi[:, i:i + 1] + ATOM_BASES[i]))
    mask = mask | (iota == (ATOM_TOTAL + 1))                # bias column -> 1.0
    lhs = jnp.where(mask, 1.0, 0.0).astype(jnp.float32)
    # Passthrough feature column.
    lhs = jnp.where(iota == ATOM_TOTAL, x[:, NUM_IDX:NUM_IDX + 1], lhs)

    o_ref[...] = jnp.dot(lhs, w_ref[...],
                         preferred_element_type=jnp.float32)  # one lane-dense store


def _edge_kernel(e_ref, t_ref, o_ref):
    """embed_bond_chem(edge_attr) as ONE matmul with a lane-dense (128-padded) store."""
    e = e_ref[...]                                           # [TE, Fe] f32
    te = e.shape[0]
    kf = t_ref.shape[0]                                      # 20 + (Fe - 2)
    ei = e[:, :NUM_EIDX].astype(jnp.int32)

    iota = jax.lax.broadcasted_iota(jnp.int32, (te, kf), 1)
    mask = iota == (ei[:, 0:1] + BOND_BASES[0])
    mask = mask | (iota == (ei[:, 1:2] + BOND_BASES[1]))
    lhs = jnp.where(mask, 1.0, 0.0).astype(jnp.float32)
    n_pass = kf - BOND_TOTAL
    for j in range(n_pass):                                  # passthrough columns
        lhs = jnp.where(iota == (BOND_TOTAL + j),
                        e[:, NUM_EIDX + j:NUM_EIDX + j + 1], lhs)

    o_ref[...] = jnp.dot(lhs, t_ref[...],
                         preferred_element_type=jnp.float32)


# ---------------------------------------------------------------------------
# Host-side parameter packing (run ONCE, not per forward call)
# ---------------------------------------------------------------------------
def prepare_node_params(atom_tables, w, b):
    """Fold block_diag(atom_tables), the Linear weight, passthrough row and bias
    into W_node [ATOM_TOTAL + 2, out_pad]."""
    emb = int(atom_tables[0].shape[1])
    out_features = int(w.shape[1])
    out_pad = _round_up(out_features, 128)
    w = w.astype(jnp.float32)
    b = b.astype(jnp.float32)
    assert w.shape[0] == NUM_IDX * emb + 1, "Linear expects 5*C embedding cols + 1 feature"

    blocks = [
        jnp.dot(atom_tables[i].astype(jnp.float32),
                w[i * emb:(i + 1) * emb],
                precision=jax.lax.Precision.HIGHEST)            # [vocab_i, out]
        for i in range(NUM_IDX)
    ]
    w_node = jnp.concatenate(
        blocks + [w[NUM_IDX * emb:], b[None, :]], axis=0)       # [142, out]
    w_node = jnp.pad(w_node, ((0, 0), (0, out_pad - out_features)))
    return w_node, out_features


def prepare_edge_table(bond_tables, n_pass):
    """Fused bond table [20 + n_pass, out_pad] mapping onehot|passthrough -> output."""
    bemb = int(bond_tables[0].shape[1])
    out_f = NUM_EIDX * bemb + n_pass
    out_pad = _round_up(out_f, 128)
    t0 = jnp.pad(bond_tables[0].astype(jnp.float32),
                 ((0, 0), (0, out_pad - bemb)))
    t1 = jnp.pad(bond_tables[1].astype(jnp.float32),
                 ((0, 0), (bemb, out_pad - 2 * bemb)))
    eye = jnp.pad(jnp.eye(n_pass, dtype=jnp.float32),
                  ((0, 0), (NUM_EIDX * bemb, out_pad - out_f)))
    table = jnp.concatenate([t0, t1, eye], axis=0)              # [20+n_pass, out_pad]
    return table, out_f, out_pad


# ---------------------------------------------------------------------------
# Pallas wrappers
# ---------------------------------------------------------------------------
def baseline_node_forward(x, w_node, out_features, *, tile_n=1024):
    """node_embedding = Linear(embed_atom_chem(x)) using the pre-folded W_node."""
    N, F = x.shape
    assert F == NUM_IDX + 1, "Baseline_Models expects 5 index columns + 1 feature"
    kf, out_pad = int(w_node.shape[0]), int(w_node.shape[1])
    assert kf == ATOM_TOTAL + 2

    tile = _choose_tile(N, tile_n)
    n_pad = _round_up(N, tile)
    if n_pad != N:                                  # padded rows use index 0 (valid)
        x = jnp.pad(x, ((0, n_pad - N), (0, 0)))

    out = pl.pallas_call(
        _node_kernel,
        out_shape=jax.ShapeDtypeStruct((n_pad, out_pad), jnp.float32),
        grid_spec=pltpu.PrefetchScalarGridSpec(
            num_scalar_prefetch=0,
            grid=(n_pad // tile,),
            in_specs=[
                pl.BlockSpec((tile, F), lambda i: (i, 0)),
                pl.BlockSpec((kf, out_pad), lambda i: (0, 0)),   # resident parameters
            ],
            out_specs=pl.BlockSpec((tile, out_pad), lambda i: (i, 0)),
        ),
        compiler_params=pltpu.CompilerParams(
            dimension_semantics=("parallel",)),
    )(x, w_node)
    return out[:N, :out_features]


def embed_bond_chem_pallas(edge_attr, bond_tables, *, tile_e=1024):
    """Standalone new_edge_attr = embed_bond_chem(edge_attr).

    NOT launched by baseline_forward: the module's forward never consumes it."""
    E, Fe = edge_attr.shape
    assert Fe >= NUM_EIDX
    n_pass = Fe - NUM_EIDX
    table, out_f, out_pad = prepare_edge_table(bond_tables, n_pass)
    kf = int(table.shape[0])

    tile = _choose_tile(E, tile_e)
    e_pad = _round_up(E, tile)
    if e_pad != E:
        edge_attr = jnp.pad(edge_attr, ((0, e_pad - E), (0, 0)))

    out = pl.pallas_call(
        _edge_kernel,
        out_shape=jax.ShapeDtypeStruct((e_pad, out_pad), jnp.float32),
        grid_spec=pltpu.PrefetchScalarGridSpec(
            num_scalar_prefetch=0,
            grid=(e_pad // tile,),
            in_specs=[
                pl.BlockSpec((tile, Fe), lambda i: (i, 0)),
                pl.BlockSpec((kf, out_pad), lambda i: (0, 0)),
            ],
            out_specs=pl.BlockSpec((tile, out_pad), lambda i: (i, 0)),
        ),
        compiler_params=pltpu.CompilerParams(
            dimension_semantics=("parallel",)),
    )(edge_attr, table)
    return out[:E, :out_f]


def baseline_forward(x, edge_attr, node_params):
    """Matches Baseline_Models.forward at default depths: returns node_embedding only.

    embed_bond_chem(edge_attr) is dead code in that configuration, so its kernel
    launch is skipped entirely (use embed_bond_chem_pallas if it is needed)."""
    del edge_attr
    w_node, out_features = node_params
    return baseline_node_forward(x, w_node, out_features)


# ---------------------------------------------------------------------------
# Pure-JAX references (match the PyTorch forward)
# ---------------------------------------------------------------------------
def _ref_embed_atom(x, tables):
    embs = [jnp.take(t, x[:, i].astype(jnp.int32), axis=0) for i, t in enumerate(tables)]
    return jnp.concatenate(embs + [x[:, NUM_IDX:]], axis=1)


def _ref_embed_bond(e, tables):
    embs = [jnp.take(t, e[:, i].astype(jnp.int32), axis=0) for i, t in enumerate(tables)]
    return jnp.concatenate(embs + [e[:, NUM_EIDX:]], axis=1)


def _ref_forward(x, atom_tables, w, b):
    new_x = _ref_embed_atom(x, atom_tables)
    return jnp.dot(new_x, w, precision=jax.lax.Precision.HIGHEST) + b


if __name__ == "__main__":
    key = jax.random.PRNGKey(0)
    ks = jax.random.split(key, 16)

    atom_channels, bond_channels, out_features = 16, 16, 64
    N, E = 256, 512                                  # small graph

    atom_tables = tuple(
        jax.random.normal(ks[i], (ATOM_VOCABS[i], atom_channels), jnp.float32)
        for i in range(NUM_IDX))
    bond_tables = tuple(
        jax.random.normal(ks[5 + i], (BOND_VOCABS[i], bond_channels), jnp.float32)
        for i in range(NUM_EIDX))

    in_atom = NUM_IDX * atom_channels + 1            # = 81 (Linear in_features)
    w = jax.random.normal(ks[7], (in_atom, out_features), jnp.float32) / (in_atom ** 0.5)
    b = jax.random.normal(ks[8], (out_features,), jnp.float32) * 0.1

    # batch_data.x : 5 integer columns (stored as float) + 1 float feature
    atom_idx = jax.random.randint(ks[9], (N, 1), 0, ATOM_VOCABS[0]).astype(jnp.float32)
    other_idx = jax.random.randint(ks[10], (N, 4), 0, 10).astype(jnp.float32)
    atom_feat = jax.random.normal(ks[11], (N, 1), jnp.float32)
    x = jnp.concatenate([atom_idx, other_idx, atom_feat], axis=1)        # [N, 6]

    # batch_data.edge_attr : 2 integer columns + 1 float feature
    bond_idx = jax.random.randint(ks[12], (E, 2), 0, 10).astype(jnp.float32)
    bond_feat = jax.random.normal(ks[13], (E, 1), jnp.float32)
    edge_attr = jnp.concatenate([bond_idx, bond_feat], axis=1)           # [E, 3]

    # Host-side weight fold runs once; the forward only launches the node kernel.
    node_params = prepare_node_params(atom_tables, w, b)
    node_params = jax.block_until_ready(node_params)

    node_embedding = baseline_forward(x, edge_attr, node_params)
    node_embedding = jax.block_until_ready(node_embedding)

    # Standalone edge-embedding kernel verified separately (not on the forward path).
    new_edge_attr = jax.block_until_ready(embed_bond_chem_pallas(edge_attr, bond_tables))

    ref_node = _ref_forward(x, atom_tables, w, b)
    ref_edge = _ref_embed_bond(edge_attr, bond_tables)

    assert node_embedding.shape == (N, out_features)
    assert new_edge_attr.shape == (E, NUM_EIDX * bond_channels + 1)
    assert jnp.allclose(node_embedding, ref_node, atol=2e-3, rtol=2e-3), (
        float(jnp.max(jnp.abs(node_embedding - ref_node))))
    assert jnp.allclose(new_edge_attr, ref_edge, atol=1e-4, rtol=1e-4), (
        float(jnp.max(jnp.abs(new_edge_attr - ref_edge))))
    print("KERNEL_OK")
</pallas_src>

<mosaic_0001>
module attributes {stable_mosaic.version = 11 : i64} {
  func.func @_node_kernel(%arg0: i32, %arg1: memref<256x6xf32, #tpu.memory_space<vmem>>, %arg2: memref<142x128xf32, #tpu.memory_space<vmem>>, %arg3: memref<256x128xf32, #tpu.memory_space<vmem>>) attributes {dimension_semantics = [#tpu.dimension_semantics<parallel>], iteration_bounds = array<i64: 1>, scalar_prefetch = 0 : i64, scratch_operands = 0 : i64, tpu.core_type = #tpu.core_type<tc>, window_params = [{transform_indices = @transform_0, window_bounds = array<i64: 256, 6>}, {pipeline_mode = #tpu.pipeline_mode<synchronous>, transform_indices = @transform_1, window_bounds = array<i64: 142, 128>}, {transform_indices = @transform_2, window_bounds = array<i64: 256, 128>}]} {
    %c0 = arith.constant 0 : index
    %c0_0 = arith.constant 0 : index
    %0 = vector.load %arg1[%c0, %c0_0] : memref<256x6xf32, #tpu.memory_space<vmem>>, vector<256x6xf32>
    %1 = vector.extract_strided_slice %0 {offsets = [0, 0], sizes = [256, 5], strides = [1, 1]} : vector<256x6xf32> to vector<256x5xf32>
    %2 = arith.fptosi %1 : vector<256x5xf32> to vector<256x5xi32>
    %3 = tpu.iota {dimensions = array<i32: 1>} : vector<256x142xi32>
    %4 = vector.extract_strided_slice %2 {offsets = [0, 0], sizes = [256, 1], strides = [1, 1]} : vector<256x5xi32> to vector<256x1xi32>
    %c0_i32 = arith.constant 0 : i32
    %5 = vector.broadcast %c0_i32 : i32 to vector<256x1xi32>
    %6 = arith.addi %4, %5 : vector<256x1xi32>
    %7 = vector.broadcast %6 : vector<256x1xi32> to vector<256x142xi32>
    %8 = arith.cmpi eq, %3, %7 : vector<256x142xi32>
    %9 = vector.extract_strided_slice %2 {offsets = [0, 1], sizes = [256, 1], strides = [1, 1]} : vector<256x5xi32> to vector<256x1xi32>
    %c100_i32 = arith.constant 100 : i32
    %10 = vector.broadcast %c100_i32 : i32 to vector<256x1xi32>
    %11 = arith.addi %9, %10 : vector<256x1xi32>
    %12 = vector.broadcast %11 : vector<256x1xi32> to vector<256x142xi32>
    %13 = arith.cmpi eq, %3, %12 : vector<256x142xi32>
    %14 = arith.ori %8, %13 : vector<256x142xi1>
    %15 = vector.extract_strided_slice %2 {offsets = [0, 2], sizes = [256, 1], strides = [1, 1]} : vector<256x5xi32> to vector<256x1xi32>
    %c110_i32 = arith.constant 110 : i32
    %16 = vector.broadcast %c110_i32 : i32 to vector<256x1xi32>
    %17 = arith.addi %15, %16 : vector<256x1xi32>
    %18 = vector.broadcast %17 : vector<256x1xi32> to vector<256x142xi32>
    %19 = arith.cmpi eq, %3, %18 : vector<256x142xi32>
    %20 = arith.ori %14, %19 : vector<256x142xi1>
    %21 = vector.extract_strided_slice %2 {offsets = [0, 3], sizes = [256, 1], strides = [1, 1]} : vector<256x5xi32> to vector<256x1xi32>
    %c120_i32 = arith.constant 120 : i32
    %22 = vector.broadcast %c120_i32 : i32 to vector<256x1xi32>
    %23 = arith.addi %21, %22 : vector<256x1xi32>
    %24 = vector.broadcast %23 : vector<256x1xi32> to vector<256x142xi32>
    %25 = arith.cmpi eq, %3, %24 : vector<256x142xi32>
    %26 = arith.ori %20, %25 : vector<256x142xi1>
    %27 = vector.extract_strided_slice %2 {offsets = [0, 4], sizes = [256, 1], strides = [1, 1]} : vector<256x5xi32> to vector<256x1xi32>
    %c130_i32 = arith.constant 130 : i32
    %28 = vector.broadcast %c130_i32 : i32 to vector<256x1xi32>
    %29 = arith.addi %27, %28 : vector<256x1xi32>
    %30 = vector.broadcast %29 : vector<256x1xi32> to vector<256x142xi32>
    %31 = arith.cmpi eq, %3, %30 : vector<256x142xi32>
    %32 = arith.ori %26, %31 : vector<256x142xi1>
    %c141_i32 = arith.constant 141 : i32
    %33 = vector.broadcast %c141_i32 : i32 to vector<256x142xi32>
    %34 = arith.cmpi eq, %3, %33 : vector<256x142xi32>
    %35 = arith.ori %32, %34 : vector<256x142xi1>
    %cst = arith.constant 1.000000e+00 : f32
    %cst_1 = arith.constant 0.000000e+00 : f32
    %36 = vector.broadcast %cst : f32 to vector<256x142xf32>
    %37 = vector.broadcast %cst_1 : f32 to vector<256x142xf32>
    %38 = arith.select %35, %36, %37 : vector<256x142xi1>, vector<256x142xf32>
    %c140_i32 = arith.constant 140 : i32
    %39 = vector.broadcast %c140_i32 : i32 to vector<256x142xi32>
    %40 = arith.cmpi eq, %3, %39 : vector<256x142xi32>
    %41 = vector.extract_strided_slice %0 {offsets = [0, 5], sizes = [256, 1], strides = [1, 1]} : vector<256x6xf32> to vector<256x1xf32>
    %42 = vector.shape_cast %41 : vector<256x1xf32> to vector<256x1xf32>
    %43 = vector.broadcast %42 : vector<256x1xf32> to vector<256x142xf32>
    %44 = arith.select %40, %43, %38 : vector<256x142xi1>, vector<256x142xf32>
    %c0_2 = arith.constant 0 : index
    %c0_3 = arith.constant 0 : index
    %45 = vector.load %arg2[%c0_2, %c0_3] : memref<142x128xf32, #tpu.memory_space<vmem>>, vector<142x128xf32>
    %cst_4 = arith.constant dense<0.000000e+00> : vector<256x128xf32>
    %46 = tpu.matmul %44, %45, %cst_4 {dimension_numbers = #tpu.dot_dimension_numbers<[1], [0], [0], [1], [0, 0, 1, 1], [], []>} : vector<256x142xf32>, vector<142x128xf32>, vector<256x128xf32> -> vector<256x128xf32>
    %c0_5 = arith.constant 0 : index
    %c0_6 = arith.constant 0 : index
    %47 = vector.load %arg3[%c0_5, %c0_6] : memref<256x128xf32, #tpu.memory_space<vmem>>, vector<256x128xf32>
    tpu.vector_store %arg3[%c0_5, %c0_6], %46 {strides = array<i32>} : memref<256x128xf32, #tpu.memory_space<vmem>>, vector<256x128xf32>,
    return
  }
  func.func @transform_0(%arg0: i32) -> (i32, i32) {
    %c0_i32 = arith.constant 0 : i32
    %c0_i32_0 = arith.constant 0 : i32
    return %arg0, %c0_i32 : i32, i32
  }
  func.func @transform_1(%arg0: i32) -> (i32, i32) {
    %c0_i32 = arith.constant 0 : i32
    %c0_i32_0 = arith.constant 0 : i32
    %c0_i32_1 = arith.constant 0 : i32
    return %c0_i32, %c0_i32_0 : i32, i32
  }
  func.func @transform_2(%arg0: i32) -> (i32, i32) {
    %c0_i32 = arith.constant 0 : i32
    %c0_i32_0 = arith.constant 0 : i32
    return %arg0, %c0_i32 : i32, i32
  }
}

</mosaic_0001>

<bundles_post_ra>
// kernel: tpu_custom_call.1
= control target key start
LH: loop header
LB: loop body
LE: loop exit
PB: predicated region body
PF: predicated region fallthrough
CT: control target
= control target key end

     0   :  { %v2265_v3 = vmov 0   ;;  %s4923_s0 = inlined_call_operand.vmem [shape: f32[256,6], index: 0, kind: input, shape index: {}]   ;;  %s4924_s1 = inlined_call_operand.vmem [shape: f32[142,128], index: 1, kind: input, shape index: {}]   ;;  %s4925_s2 = inlined_call_operand.hbm [shape: f32[256,128], index: 2, kind: output, shape index: {}]  }
   0x1   :  { %v2295_v0 = vld [vmem:[%s4923_s0 + $0x10] sm:$0xff]  ;;  %v2300_v1 = vld [vmem:[%s4923_s0] sm:$0xff]  ;;  %v2305_v2 = vld [vmem:[%s4923_s0 + $0x18] sm:$0xff]  ;;  %2167 = vset.pattern.permute.xlu1 %v2265_v3  ;;  %2166 = vset.pattern.permute.xlu0 %v2265_v3 }
   0x2   :  { %v2094_v4 = vtrunc.f32 %v2295_v0  ;;  %v2090_v5 = vtrunc.f32 %v2300_v1  ;;  %v2096_v6 = vtrunc.f32 %v2305_v2  ;;  %v2313_v7 = vld [vmem:[%s4923_s0 + $0x8] sm:$0xff]  ;;  %v16_v10 = vld [vmem:[%s4923_s0 + $0x20] sm:$0xff]  ;;  %v19_v17 = vld [vmem:[%s4923_s0 + $0x38] sm:$0xff] }
   0x3   :  { %v2092_v8 = vtrunc.f32 %v2313_v7  ;;  %v17_v9 = vld [vmem:[%s4923_s0 + $0x28] sm:$0xff]  ;;  %v2098_v16 = vtrunc.f32 %v16_v10  ;;  %v2338_v18 = vld [vmem:[%s4923_s0 + $0x30] sm:$0xff]  ;;  %v2104_v21 = vtrunc.f32 %v19_v17  ;;  %v20_v24 = vld [vmem:[%s4923_s0 + $0x40] sm:$0xff] }
   0x4   :  { %v2322_v11 = vcvt.f32.s32 %v2094_v4  ;;  %v2324_v12 = vcvt.f32.s32 %v2090_v5  ;;  %v2328_v13 = vcvt.f32.s32 %v2096_v6  ;;  %v2100_v15 = vtrunc.f32 %v17_v9  ;;  %v21_v23 = vld [vmem:[%s4923_s0 + $0x48] sm:$0xff] }
   0x5   :  { %v2330_v14 = vcvt.f32.s32 %v2092_v8  ;;  %v2344_v20 = vcvt.f32.s32 %v2098_v16  ;;  %v2102_v22 = vtrunc.f32 %v2338_v18 }
   0x6   :  { %86 = vperm.xlu1 %2167, %v2322_v11   ;;  %80 = vperm.xlu0 %2166, %v2324_v12   ;;  %v2342_v19 = vcvt.f32.s32 %v2100_v15 }
   0xa   :  { %89 = vperm.xlu1 %2167, %v2328_v13   ;;  %83 = vperm.xlu0 %2166, %v2330_v14  }
   0xb   :  { %7 = vsyncpa [#allocation3], 0  ;;  %v2355_v25 = vcvt.f32.s32 %v2104_v21  ;;  %v2357_v26 = vcvt.f32.s32 %v2102_v22  ;;  %v2108_v27 = vtrunc.f32 %v21_v23  ;;  %v2106_v28 = vtrunc.f32 %v20_v24  ;;  %v23_v29 = vld [vmem:[%s4923_s0 + $0x58] sm:$0xff]  ;;  %v22_v30 = vld [vmem:[%s4923_s0 + $0x50] sm:$0xff] }
   0xc   :  { %v2112_v33 = vtrunc.f32 %v23_v29  ;;  %v2110_v34 = vtrunc.f32 %v22_v30  ;;  %v25_v35 = vld [vmem:[%s4923_s0 + $0x68] sm:$0xff]  ;;  %v24_v36 = vld [vmem:[%s4923_s0 + $0x60] sm:$0xff]  ;;  %v27_v41 = vld [vmem:[%s4923_s0 + $0x78] sm:$0xff]  ;;  %vm1734_vm0 = vcmask 1045504   ;;  %vm2272_vm1 = vmmov 1  }
   0xd   :  { %v2367_v31 = vcvt.f32.s32 %v2108_v27  ;;  %v2369_v32 = vcvt.f32.s32 %v2106_v28  ;;  %v2116_v39 = vtrunc.f32 %v25_v35  ;;  %v2114_v40 = vtrunc.f32 %v24_v36  ;;  %v26_v42 = vld [vmem:[%s4923_s0 + $0x70] sm:$0xff]  ;;  %v2398_v47 = vld [vmem:[%s4923_s0 + $0x88] sm:$0xff]  ;;  %v2403_v48 = vld [vmem:[%s4923_s0 + $0x80] sm:$0xff] }
   0xe   :  { %95 = vperm.xlu1 %2167, %v2342_v19   ;;  %92 = vperm.xlu0 %2166, %v2344_v20   ;;  %v2379_v37 = vcvt.f32.s32 %v2112_v33  ;;  %v2381_v38 = vcvt.f32.s32 %v2110_v34  ;;  %v2120_v45 = vtrunc.f32 %v27_v41  ;;  %v2118_v46 = vtrunc.f32 %v26_v42  ;;  %v2416_v53 = vld [vmem:[%s4923_s0 + $0x98] sm:$0xff]  ;;  %v2421_v54 = vld [vmem:[%s4923_s0 + $0x90] sm:$0xff]  ;;  %v2434_v59 = vld [vmem:[%s4923_s0 + $0xa8] sm:$0xff] }
   0xf   :  { %v2391_v43 = vcvt.f32.s32 %v2116_v39  ;;  %v2393_v44 = vcvt.f32.s32 %v2114_v40  ;;  %v2124_v51 = vtrunc.f32 %v2398_v47  ;;  %v2122_v52 = vtrunc.f32 %v2403_v48  ;;  %v2439_v60 = vld [vmem:[%s4923_s0 + $0xa0] sm:$0xff]  ;;  %v2452_v4 = vld [vmem:[%s4923_s0 + $0xb8] sm:$0xff]  ;;  %v2457_v5 = vld [vmem:[%s4923_s0 + $0xb0] sm:$0xff] }
  0x10   :  { %v2407_v49 = vcvt.f32.s32 %v2120_v45  ;;  %v2409_v50 = vcvt.f32.s32 %v2118_v46  ;;  %v2128_v57 = vtrunc.f32 %v2416_v53  ;;  %v2126_v58 = vtrunc.f32 %v2421_v54  ;;  %v37_v15 = vld [vmem:[%s4923_s0 + $0xc8] sm:$0xff]  ;;  %v36_v16 = vld [vmem:[%s4923_s0 + $0xc0] sm:$0xff]  ;;  %v39_v24 = vld [vmem:[%s4923_s0 + $0xd8] sm:$0xff] }
  0x11   :  { %v2425_v55 = vcvt.f32.s32 %v2124_v51  ;;  %v2427_v56 = vcvt.f32.s32 %v2122_v52  ;;  %v2132_v63 = vtrunc.f32 %v2434_v59  ;;  %v2130_v3 = vtrunc.f32 %v2439_v60  ;;  %v38_v27 = vld [vmem:[%s4923_s0 + $0xd0] sm:$0xff]  ;;  %v41_v34 = vld [vmem:[%s4923_s0 + $0xe8] sm:$0xff]  ;;  %v40_v35 = vld [vmem:[%s4923_s0 + $0xe0] sm:$0xff] }
  0x12   :  { %101 = vperm.xlu1 %2167, %v2355_v25   ;;  %98 = vperm.xlu0 %2166, %v2357_v26   ;;  %5007 = vst [vmem:[#allocation5_spill] sm:$0xff] %v2407_v49  ;;  %5008 = vst [vmem:[#allocation6_spill] sm:$0xff] %v2409_v50  ;;  %v2443_v61 = vcvt.f32.s32 %v2128_v57  ;;  %v2445_v62 = vcvt.f32.s32 %v2126_v58  ;;  %v2136_v9 = vtrunc.f32 %v2452_v4  ;;  %v2134_v10 = vtrunc.f32 %v2457_v5  ;;  %v43_v42 = vld [vmem:[%s4923_s0 + $0xf8] sm:$0xff]  ;;  %v42_v45 = vld [vmem:[%s4923_s0 + $0xf0] sm:$0xff] }
  0x13   :  { %v2461_v6 = vcvt.f32.s32 %v2132_v63  ;;  %v2463_v8 = vcvt.f32.s32 %v2130_v3  ;;  %v2140_v22 = vtrunc.f32 %v37_v15  ;;  %v2138_v23 = vtrunc.f32 %v36_v16  ;;  %vm2070_vm2 = vmpackc.low %vm1734_vm0, %vm2272_vm1 }
  0x14   :  { %v2475_v17 = vcvt.f32.s32 %v2136_v9  ;;  %v2477_v21 = vcvt.f32.s32 %v2134_v10  ;;  %v2144_v30 = vtrunc.f32 %v39_v24  ;;  %v2142_v33 = vtrunc.f32 %v38_v27 }
  0x15   :  { %v2487_v28 = vcvt.f32.s32 %v2140_v22  ;;  %v2489_v29 = vcvt.f32.s32 %v2138_v23  ;;  %v2148_v40 = vtrunc.f32 %v41_v34  ;;  %v2146_v41 = vtrunc.f32 %v40_v35 }
  0x16   :  { %107 = vperm.xlu1 %2167, %v2367_v31   ;;  %104 = vperm.xlu0 %2166, %v2369_v32   ;;  %v2499_v36 = vcvt.f32.s32 %v2144_v30  ;;  %v2501_v39 = vcvt.f32.s32 %v2142_v33  ;;  %v2152_v52 = vtrunc.f32 %v43_v42  ;;  %v2150_v57 = vtrunc.f32 %v42_v45 }
  0x17   :  { %v2511_v46 = vcvt.f32.s32 %v2148_v40  ;;  %v2513_v51 = vcvt.f32.s32 %v2146_v41  ;;  %v240_v3 = vadd.s32 100, %v2330_v14  ;;  %v239_v9 = vadd.s32 100, %v2324_v12 }
  0x18   :  { %v2517_v58 = vcvt.f32.s32 %v2152_v52  ;;  %v2519_v63 = vcvt.f32.s32 %v2150_v57  ;;  %v2266_v10 = vmov 1   ;;  %v241_v15 = vadd.s32 100, %v2322_v11 }
  0x19   :  { %v242_v16 = vadd.s32 100, %v2328_v13  ;;  %v243_v22 = vadd.s32 100, %v2344_v20  ;;  %v244_v23 = vadd.s32 100, %v2342_v19  ;;  %v245_v24 = vadd.s32 100, %v2357_v26 }
  0x1a   :  { %113 = vperm.xlu1 %2167, %v2379_v37   ;;  %110 = vperm.xlu0 %2166, %v2381_v38   ;;  %5009 = vst [vmem:[#allocation7_spill] sm:$0xff] %v2517_v58  ;;  %5010 = vst [vmem:[#allocation8_spill] sm:$0xff] %v2519_v63  ;;  %v246_v27 = vadd.s32 100, %v2355_v25  ;;  %v247_v30 = vadd.s32 100, %v2369_v32  ;;  %v248_v33 = vadd.s32 100, %v2367_v31  ;;  %v249_v34 = vadd.s32 100, %v2381_v38 }
  0x1b   :  { %v250_v35 = vadd.s32 100, %v2379_v37  ;;  %v251_v40 = vadd.s32 100, %v2393_v44  ;;  %v252_v41 = vadd.s32 100, %v2391_v43  ;;  %v253_v42 = vadd.s32 100, %v2409_v50 }
  0x1c   :  { %v254_v45 = vadd.s32 100, %v2407_v49  ;;  %v255_v52 = vadd.s32 100, %v2427_v56  ;;  %v256_v57 = vadd.s32 100, %v2425_v55 }
  0x1e   :  { %119 = vperm.xlu1 %2167, %v2391_v43   ;;  %116 = vperm.xlu0 %2166, %v2393_v44  }
  0x22   :  { %125 = vperm.xlu1 %2167, %v2407_v49   ;;  %122 = vperm.xlu0 %2166, %v2409_v50  }
  0x26   :  { %131 = vperm.xlu1 %2167, %v2425_v55   ;;  %128 = vperm.xlu0 %2166, %v2427_v56  }
  0x2a   :  { %137 = vperm.xlu1 %2167, %v2443_v61   ;;  %134 = vperm.xlu0 %2166, %v2445_v62  }
  0x2e   :  { %143 = vperm.xlu1 %2167, %v2461_v6   ;;  %140 = vperm.xlu0 %2166, %v2463_v8  }
  0x32   :  { %149 = vperm.xlu1 %2167, %v2475_v17   ;;  %146 = vperm.xlu0 %2166, %v2477_v21  }
  0x36   :  { %155 = vperm.xlu1 %2167, %v2487_v28   ;;  %152 = vperm.xlu0 %2166, %v2489_v29  }
  0x3a   :  { %161 = vperm.xlu1 %2167, %v2499_v36   ;;  %158 = vperm.xlu0 %2166, %v2501_v39  }
  0x3e   :  { %167 = vperm.xlu1 %2167, %v2511_v46   ;;  %164 = vperm.xlu0 %2166, %v2513_v51  }
  0x42   :  { %173 = vperm.xlu1 %2167, %v2517_v58   ;;  %170 = vperm.xlu0 %2166, %v2519_v63  }
  0x46   :  { %2169 = vset.pattern.permute.xlu1 %v2266_v10  ;;  %2168 = vset.pattern.permute.xlu0 %v2266_v10  ;;  %v259_v10 = vadd.s32 100, %v2463_v8 }
  0x47   :  { %275 = vperm.xlu1 %2169, %v240_v3   ;;  %272 = vperm.xlu0 %2168, %v239_v9   ;;  %v257_v3 = vadd.s32 100, %v2445_v62  ;;  %v258_v9 = vadd.s32 100, %v2443_v61 }
  0x4b   :  { %278 = vperm.xlu1 %2169, %v241_v15   ;;  %281 = vperm.xlu0 %2168, %v242_v16   ;;  %v260_v15 = vadd.s32 100, %v2461_v6  ;;  %v261_v16 = vadd.s32 100, %v2477_v21 }
  0x4f   :  { %284 = vperm.xlu1 %2169, %v243_v22   ;;  %287 = vperm.xlu0 %2168, %v244_v23   ;;  %v262_v22 = vadd.s32 100, %v2475_v17  ;;  %v263_v23 = vadd.s32 100, %v2489_v29 }
  0x53   :  { %290 = vperm.xlu1 %2169, %v245_v24   ;;  %293 = vperm.xlu0 %2168, %v246_v27   ;;  %v264_v24 = vadd.s32 100, %v2487_v28  ;;  %v265_v27 = vadd.s32 100, %v2501_v39 }
  0x57   :  { %296 = vperm.xlu1 %2169, %v247_v30   ;;  %299 = vperm.xlu0 %2168, %v248_v33   ;;  %v266_v30 = vadd.s32 100, %v2499_v36  ;;  %v267_v33 = vadd.s32 100, %v2513_v51 }
  0x5b   :  { %302 = vperm.xlu1 %2169, %v249_v34   ;;  %305 = vperm.xlu0 %2168, %v250_v35   ;;  %v268_v34 = vadd.s32 100, %v2511_v46  ;;  %v269_v35 = vadd.s32 100, %v2519_v63 }
  0x5f   :  { %308 = vperm.xlu1 %2169, %v251_v40   ;;  %311 = vperm.xlu0 %2168, %v252_v41   ;;  %v270_v40 = vadd.s32 100, %v2517_v58  ;;  %v495_v41 = vadd.s32 110, %v2324_v12 }
  0x63   :  { %314 = vperm.xlu1 %2169, %v253_v42   ;;  %317 = vperm.xlu0 %2168, %v254_v45   ;;  %v496_v42 = vadd.s32 110, %v2330_v14 }
  0x67   :  { %320 = vperm.xlu1 %2169, %v255_v52   ;;  %323 = vperm.xlu0 %2168, %v256_v57   ;;  %v2267_v57 = vmov 2  }
  0x6b   :  { %326 = vperm.xlu1 %2169, %v257_v3   ;;  %329 = vperm.xlu0 %2168, %v258_v9   ;;  %v497_v3 = vadd.s32 110, %v2322_v11  ;;  %v499_v9 = vadd.s32 110, %v2344_v20 }
  0x6f   :  { %332 = vperm.xlu1 %2169, %v259_v10   ;;  %335 = vperm.xlu0 %2168, %v260_v15  }
  0x73   :  { %338 = vperm.xlu1 %2169, %v261_v16   ;;  %341 = vperm.xlu0 %2168, %v262_v22   ;;  %v498_v16 = vadd.s32 110, %v2328_v13  ;;  %v501_v22 = vadd.s32 110, %v2357_v26 }
  0x77   :  { %344 = vperm.xlu1 %2169, %v263_v23   ;;  %347 = vperm.xlu0 %2168, %v264_v24  }
  0x7b   :  { %350 = vperm.xlu1 %2169, %v265_v27   ;;  %353 = vperm.xlu0 %2168, %v266_v30   ;;  %v500_v27 = vadd.s32 110, %v2342_v19  ;;  %v503_v30 = vadd.s32 110, %v2369_v32 }
  0x7f   :  { %356 = vperm.xlu1 %2169, %v267_v33   ;;  %359 = vperm.xlu0 %2168, %v268_v34  }
  0x83   :  { %362 = vperm.xlu1 %2169, %v269_v35   ;;  %365 = vperm.xlu0 %2168, %v270_v40   ;;  %v502_v35 = vadd.s32 110, %v2355_v25  ;;  %v505_v40 = vadd.s32 110, %v2381_v38 }
  0x85   :  { %v2557_v45 = vpop.permute.xlu1 %86  ;;  %v2559_v52 = vpop.permute.xlu0 %80 }
  0x87   :  { %2170 = vset.pattern.permute.xlu1 %v2267_v57  ;;  %2171 = vset.pattern.permute.xlu0 %v2267_v57  ;;  %v504_v57 = vadd.s32 110, %v2367_v31 }
  0x88   :  { %528 = vperm.xlu1 %2170, %v495_v41   ;;  %531 = vperm.xlu0 %2171, %v496_v42  }
  0x89   :  { %v2563_v10 = vpop.permute.xlu1 %89  ;;  %v2565_v15 = vpop.permute.xlu0 %83 }
  0x8c   :  { %534 = vperm.xlu1 %2170, %v497_v3   ;;  %540 = vperm.xlu0 %2171, %v499_v9   ;;  %v507_v3 = vadd.s32 110, %v2393_v44 }
  0x8d   :  { %v2569_v23 = vpop.permute.xlu1 %95  ;;  %v2571_v24 = vpop.permute.xlu0 %92 }
  0x8e   :  { %5011 = vst [vmem:[#allocation9_spill] sm:$0xff] %v2569_v23  ;;  %5012 = vst [vmem:[#allocation10_spill] sm:$0xff] %v2571_v24 }
  0x90   :  { %537 = vperm.xlu1 %2170, %v498_v16   ;;  %546 = vperm.xlu0 %2171, %v501_v22   ;;  %v506_v22 = vadd.s32 110, %v2379_v37 }
  0x91   :  { %v2575_v33 = vpop.permute.xlu1 %101  ;;  %v2577_v34 = vpop.permute.xlu0 %98 }
  0x92   :  { %5013 = vst [vmem:[#allocation11_spill] sm:$0xff] %v2575_v33  ;;  %5014 = vst [vmem:[#allocation12_spill] sm:$0xff] %v2577_v34 }
  0x94   :  { %543 = vperm.xlu1 %2170, %v500_v27   ;;  %552 = vperm.xlu0 %2171, %v503_v30   ;;  %v509_v27 = vadd.s32 110, %v2409_v50 }
  0x95   :  { %v2581_v41 = vpop.permute.xlu1 %107  ;;  %v2583_v42 = vpop.permute.xlu0 %104 }
  0x96   :  { %5015 = vst [vmem:[#allocation13_spill] sm:$0xff] %v2581_v41  ;;  %5016 = vst [vmem:[#allocation14_spill] sm:$0xff] %v2583_v42 }
  0x98   :  { %549 = vperm.xlu1 %2170, %v502_v35   ;;  %558 = vperm.xlu0 %2171, %v505_v40   ;;  %v508_v35 = vadd.s32 110, %v2391_v43  ;;  %v511_v40 = vadd.s32 110, %v2427_v56 }
  0x99   :  { %v2587_v9 = vpop.permute.xlu1 %113  ;;  %v2589_v16 = vpop.permute.xlu0 %110 }
  0x9a   :  { %5017 = vst [vmem:[#allocation15_spill] sm:$0xff] %v2587_v9 }
  0x9c   :  { %555 = vperm.xlu1 %2170, %v504_v57   ;;  %564 = vperm.xlu0 %2171, %v507_v3   ;;  %v510_v57 = vadd.s32 110, %v2407_v49  ;;  %v513_v3 = vadd.s32 110, %v2445_v62 }
  0x9d   :  { %v2593_v30 = vpop.permute.xlu1 %119  ;;  %v2595_v41 = vpop.permute.xlu0 %116 }
  0x9e   :  { %5018 = vst [vmem:[#allocation16_spill] sm:$0xff] %v2593_v30  ;;  %5019 = vst [vmem:[#allocation17_spill] sm:$0xff] %v2595_v41 }
  0xa0   :  { %561 = vperm.xlu1 %2170, %v506_v22   ;;  %570 = vperm.xlu0 %2171, %v509_v27   ;;  %v512_v22 = vadd.s32 110, %v2425_v55  ;;  %v515_v27 = vadd.s32 110, %v2463_v8 }
  0xa1   :  { %v2599_v42 = vpop.permute.xlu1 %125  ;;  %v2601_v9 = vpop.permute.xlu0 %122 }
  0xa2   :  { %5020 = vst [vmem:[#allocation18_spill] sm:$0xff] %v2599_v42  ;;  %5021 = vst [vmem:[#allocation19_spill] sm:$0xff] %v2601_v9 }
  0xa4   :  { %567 = vperm.xlu1 %2170, %v508_v35   ;;  %576 = vperm.xlu0 %2171, %v511_v40   ;;  %v514_v35 = vadd.s32 110, %v2443_v61  ;;  %v517_v40 = vadd.s32 110, %v2477_v21 }
  0xa5   :  { %v2605_v33 = vpop.permute.xlu1 %131  ;;  %v2607_v30 = vpop.permute.xlu0 %128 }
  0xa8   :  { %573 = vperm.xlu1 %2170, %v510_v57   ;;  %582 = vperm.xlu0 %2171, %v513_v3   ;;  %v516_v57 = vadd.s32 110, %v2461_v6  ;;  %v519_v3 = vadd.s32 110, %v2489_v29 }
  0xa9   :  { %v2611_v23 = vpop.permute.xlu1 %137  ;;  %v2613_v42 = vpop.permute.xlu0 %134 }
  0xaa   :  { %5022 = vst [vmem:[#allocation20_spill] sm:$0xff] %v2611_v23  ;;  %5023 = vst [vmem:[#allocation21_spill] sm:$0xff] %v2613_v42 }
  0xac   :  { %579 = vperm.xlu1 %2170, %v512_v22   ;;  %588 = vperm.xlu0 %2171, %v515_v27   ;;  %v518_v22 = vadd.s32 110, %v2475_v17  ;;  %v521_v27 = vadd.s32 110, %v2501_v39 }
  0xad   :  { %v2617_v34 = vpop.permute.xlu1 %143  ;;  %v2619_v24 = vpop.permute.xlu0 %140 }
  0xae   :  { %5024 = vst [vmem:[#allocation22_spill] sm:$0xff] %v2617_v34  ;;  %5025 = vst [vmem:[#allocation23_spill] sm:$0xff] %v2619_v24 }
  0xb0   :  { %585 = vperm.xlu1 %2170, %v514_v35   ;;  %594 = vperm.xlu0 %2171, %v517_v40   ;;  %v520_v35 = vadd.s32 110, %v2487_v28  ;;  %v523_v40 = vadd.s32 110, %v2513_v51 }
  0xb1   :  { %v2623_v9 = vpop.permute.xlu1 %149  ;;  %v2625_v23 = vpop.permute.xlu0 %146 }
  0xb2   :  { %5026 = vst [vmem:[#allocation24_spill] sm:$0xff] %v2623_v9  ;;  %5027 = vst [vmem:[#allocation25_spill] sm:$0xff] %v2625_v23 }
  0xb4   :  { %591 = vperm.xlu1 %2170, %v516_v57   ;;  %600 = vperm.xlu0 %2171, %v519_v3   ;;  %v522_v57 = vadd.s32 110, %v2499_v36  ;;  %v525_v3 = vadd.s32 110, %v2519_v63 }
  0xb5   :  { %v2629_v41 = vpop.permute.xlu1 %155  ;;  %v2631_v34 = vpop.permute.xlu0 %152 }
  0xb6   :  { %5028 = vst [vmem:[#allocation26_spill] sm:$0xff] %v2629_v41  ;;  %5029 = vst [vmem:[#allocation27_spill] sm:$0xff] %v2631_v34 }
  0xb8   :  { %597 = vperm.xlu1 %2170, %v518_v22   ;;  %606 = vperm.xlu0 %2171, %v521_v27   ;;  %v524_v22 = vadd.s32 110, %v2511_v46 }
  0xb9   :  { %v2635_v24 = vpop.permute.xlu1 %161  ;;  %v2637_v9 = vpop.permute.xlu0 %158 }
  0xba   :  { %5030 = vst [vmem:[#allocation28_spill] sm:$0xff] %v2635_v24  ;;  %5031 = vst [vmem:[#allocation29_spill] sm:$0xff] %v2637_v9  ;;  %v1007_v24 = vadd.s32 130, %v2324_v12  ;;  %v1026_v9 = vadd.s32 130, %v2443_v61 }
  0xbc   :  { %603 = vperm.xlu1 %2170, %v520_v35   ;;  %612 = vperm.xlu0 %2171, %v523_v40   ;;  %v4949_v35 = vmov 4   ;;  %v526_v40 = vadd.s32 110, %v2517_v58 }
  0xbd   :  { %v2641_v23 = vpop.permute.xlu1 %167  ;;  %v2643_v41 = vpop.permute.xlu0 %164 }
  0xbe   :  { %5032 = vst [vmem:[#allocation30_spill] sm:$0xff] %v2641_v23  ;;  %5033 = vst [vmem:[#allocation31_spill] sm:$0xff] %v2643_v41  ;;  %v1008_v23 = vadd.s32 130, %v2330_v14 }
  0xc0   :  { %609 = vperm.xlu1 %2170, %v522_v57   ;;  %618 = vperm.xlu0 %2171, %v525_v3   ;;  %v752_v3 = vadd.s32 120, %v2330_v14  ;;  %v755_v14 = vadd.s32 120, %v2344_v20 }
  0xc1   :  { %v2646_v27 = vpop.permute.xlu1 %173  ;;  %v2648_v34 = vpop.permute.xlu0 %170 }
  0xc2   :  { %5034 = vst [vmem:[#allocation32_spill] sm:$0xff] %v2646_v27  ;;  %5035 = vst [vmem:[#allocation33_spill] sm:$0xff] %v2648_v34  ;;  %v1009_v34 = vadd.s32 130, %v2322_v11 }
  0xc4   :  { %615 = vperm.xlu1 %2170, %v524_v22   ;;  %2173 = vset.pattern.permute.xlu0 %v4949_v35  ;;  %v4954_v35 = vmov 3  }
  0xc5   :  { %1040 = vperm.xlu0 %2173, %v1007_v24   ;;  %v753_v24 = vadd.s32 120, %v2322_v11  ;;  %v1620_v11 = vld [vmem:[%s4924_s1 + $0x8] sm:$0xff] }
  0xc6   :  { %v2654_v41 = vpop.permute.xlu1 %275  ;;  %v2656_v57 = vpop.permute.xlu0 %272 }
  0xc8   :  { %621 = vperm.xlu1 %2170, %v526_v40  }
  0xc9   :  { %1043 = vperm.xlu0 %2173, %v1008_v23  }
  0xca   :  { %v2660_v27 = vpop.permute.xlu1 %278  ;;  %v2662_v22 = vpop.permute.xlu0 %281 }
  0xcb   :  { %5036 = vst [vmem:[#allocation34_spill] sm:$0xff] %v2662_v22 }
  0xcc   :  { %2172 = vset.pattern.permute.xlu1 %v4954_v35  ;;  %v4959_v35 = vmov 5  }
  0xcd   :  { %787 = vperm.xlu1 %2172, %v752_v3   ;;  %1046 = vperm.xlu0 %2173, %v1009_v34   ;;  %v1619_v34 = vld [vmem:[%s4924_s1] sm:$0xff] }
  0xce   :  { %v2667_v42 = vpop.permute.xlu1 %284  ;;  %v2669_v23 = vpop.permute.xlu0 %287  ;;  %v2045_v3 = vpack.c.bf16 %v1620_v11, %v1619_v34 }
  0xcf   :  { %5037 = vst [vmem:[#allocation35_spill] sm:$0xff] %v2667_v42  ;;  %5038 = vst [vmem:[#allocation36_spill] sm:$0xff] %v2669_v23  ;;  %v4967_v23 = vmov 0.0|0.0  }
  0xd0   :  { %2044 = vmatprep.subr.bf16.mxu0 %v4967_v23  ;;  %2072 = vmatprep.subr.bf16.mxu1 %v4967_v23 }
  0xd1   :  { %790 = vperm.xlu1 %2172, %v753_v24   ;;  %1097 = vperm.xlu0 %2173, %v1026_v9   ;;  %v757_v9 = vadd.s32 120, %v2357_v26 }
  0xd2   :  { %v2672_v40 = vpop.permute.xlu1 %290  ;;  %v2674_v22 = vpop.permute.xlu0 %293  ;;  %2046 = vmatpush1.bf16.msra.mxu0 %v2045_v3  ;;  %2081 = vmatpush1.bf16.msra.mxu1 %v2045_v3 }
  0xd3   :  { %5039 = vst [vmem:[#allocation37_spill] sm:$0xff] %v2672_v40  ;;  %5040 = vst [vmem:[#allocation38_spill] sm:$0xff] %v2674_v22  ;;  %v1621_v40 = vld [vmem:[%s4924_s1 + $0x10] sm:$0xff]  ;;  %2047 = vmatprep.subr.bf16.mxu0 %v4967_v23  ;;  %2073 = vmatprep.subr.bf16.mxu1 %v4967_v23 }
  0xd5   :  { %796 = vperm.xlu1 %2172, %v755_v14   ;;  %2183 = vset.pattern.permute.xlu0 %v4959_v35  ;;  %v1622_v14 = vld [vmem:[%s4924_s1 + $0x18] sm:$0xff] }
  0xd6   :  { %v2684_v24 = vpop.permute.xlu1 %296  ;;  %1397 = vperm.xlu0 %2183, %v2300_v1   ;;  %v2687_v22 = vpop.permute.xlu0 %299  ;;  %v2048_v34 = vpack.c.bf16 %v1622_v14, %v1621_v40  ;;  %v759_v1 = vadd.s32 120, %v2369_v32  ;;  %v1624_v40 = vld [vmem:[%s4924_s1 + $0x28] sm:$0xff] }
  0xd7   :  { %5041 = vst [vmem:[#allocation39_spill] sm:$0xff] %v2684_v24  ;;  %5042 = vst [vmem:[#allocation40_spill] sm:$0xff] %v2687_v22  ;;  %v1623_v22 = vld [vmem:[%s4924_s1 + $0x20] sm:$0xff] }
  0xd8   :  { %2049 = vmatpush1.bf16.msra.mxu0 %v2048_v34  ;;  %2082 = vmatpush1.bf16.msra.mxu1 %v2048_v34  ;;  %v2051_v3 = vpack.c.bf16 %v1624_v40, %v1623_v22  ;;  %v1626_v22 = vld [vmem:[%s4924_s1 + $0x38] sm:$0xff]  ;;  %v1023_v40 = vadd.s32 130, %v2427_v56  ;;  %v1631_v24 = vld [vmem:[%s4924_s1 + $0x60] sm:$0xff] }
  0xd9   :  { %802 = vperm.xlu1 %2172, %v757_v9   ;;  %v767_v9 = vadd.s32 120, %v2427_v56  ;;  %2050 = vmatprep.subr.bf16.mxu0 %v4967_v23 }
  0xda   :  { %v2699_v11 = vpop.permute.xlu1 %302  ;;  %1482 = vperm.xlu0 %2183, %v2398_v47   ;;  %v2702_v35 = vpop.permute.xlu0 %305  ;;  %2074 = vmatprep.subr.bf16.mxu1 %v4967_v23 }
  0xdb   :  { %5043 = vst [vmem:[#allocation41_spill] sm:$0xff] %v2702_v35  ;;  %v1625_v35 = vld [vmem:[%s4924_s1 + $0x30] sm:$0xff] }
  0xdc   :  { %2052 = vmatpush1.bf16.msra.mxu0 %v2051_v3  ;;  %2083 = vmatpush1.bf16.msra.mxu1 %v2051_v3  ;;  %v2054_v34 = vpack.c.bf16 %v1626_v22, %v1625_v35  ;;  %v1628_v35 = vld [vmem:[%s4924_s1 + $0x48] sm:$0xff]  ;;  %v768_v22 = vadd.s32 120, %v2425_v55 }
  0xdd   :  { %808 = vperm.xlu1 %2172, %v759_v1   ;;  %2053 = vmatprep.subr.bf16.mxu0 %v4967_v23 }
  0xde   :  { %v2713_v47 = vpop.permute.xlu1 %308  ;;  %1412 = vperm.xlu0 %2183, %v2305_v2   ;;  %v2716_v14 = vpop.permute.xlu0 %311  ;;  %2075 = vmatprep.subr.bf16.mxu1 %v4967_v23 }
  0xdf   :  { %5044 = vst [vmem:[#allocation42_spill] sm:$0xff] %v2716_v14  ;;  %v1627_v14 = vld [vmem:[%s4924_s1 + $0x40] sm:$0xff] }
  0xe0   :  { %2055 = vmatpush1.bf16.msra.mxu0 %v2054_v34  ;;  %2084 = vmatpush1.bf16.msra.mxu1 %v2054_v34  ;;  %v2057_v3 = vpack.c.bf16 %v1628_v35, %v1627_v14  ;;  %v1629_v34 = vld [vmem:[%s4924_s1 + $0x50] sm:$0xff]  ;;  %v1630_v14 = vld [vmem:[%s4924_s1 + $0x58] sm:$0xff] }
  0xe1   :  { %832 = vperm.xlu1 %2172, %v767_v9   ;;  %v5046_v9 = vmov 4   ;;  %2056 = vmatprep.subr.bf16.mxu0 %v4967_v23  ;;  %v2060_v35 = vpack.c.bf16 %v1630_v14, %v1629_v34  ;;  %v751_v34 = vadd.s32 120, %v2324_v12  ;;  %v1024_v14 = vadd.s32 130, %v2425_v55  ;;  %v1633_v12 = vld [vmem:[%s4924_s1 + $0x70] sm:$0xff]  ;;  %v1634_v55 = vld [vmem:[%s4924_s1 + $0x78] sm:$0xff] }
  0xe2   :  { %v2726_v1 = vpop.permute.xlu1 %314  ;;  %1497 = vperm.xlu0 %2183, %v2439_v60   ;;  %v2729_v2 = vpop.permute.xlu0 %317  ;;  %2076 = vmatprep.subr.bf16.mxu1 %v4967_v23 }
  0xe3   :  { %5045 = vst [vmem:[#allocation43_spill] sm:$0xff] %v2729_v2 }
  0xe4   :  { %2058 = vmatpush1.bf16.msra.mxu0 %v2057_v3  ;;  %2085 = vmatpush1.bf16.msra.mxu1 %v2057_v3  ;;  %v1632_v3 = vld [vmem:[%s4924_s1 + $0x68] sm:$0xff] }
  0xe5   :  { %2174 = vset.pattern.permute.xlu1 %v5046_v9  ;;  %2059 = vmatprep.subr.bf16.mxu0 %v4967_v23 }
  0xe6   :  { %v2741_v60 = vpop.permute.xlu1 %320  ;;  %1088 = vperm.xlu1 %2174, %v1023_v40   ;;  %1427 = vperm.xlu0 %2183, %v2338_v18   ;;  %v2744_v56 = vpop.permute.xlu0 %323  ;;  %v5047_v40 = vmov 3  }
  0xe7   :  { %2077 = vmatprep.subr.bf16.mxu1 %v4967_v23 }
  0xe8   :  { %2061 = vmatpush1.bf16.msra.mxu0 %v2060_v35  ;;  %2086 = vmatpush1.bf16.msra.mxu1 %v2060_v35  ;;  %v2066_v35 = vpack.c.bf16 %v1634_v55, %v1633_v12  ;;  %v758_v12 = vadd.s32 120, %v2355_v25 }
  0xe9   :  { %2062 = vmatprep.subr.bf16.mxu0 %v4967_v23  ;;  %2078 = vmatprep.subr.bf16.mxu1 %v4967_v23 }
  0xea   :  { %v2756_v18 = vpop.permute.xlu1 %326  ;;  %2175 = vset.pattern.permute.xlu1 %v5047_v40  ;;  %1512 = vperm.xlu0 %2183, %v2452_v4   ;;  %v2760_v2 = vpop.permute.xlu0 %329  ;;  %v2063_v4 = vpack.c.bf16 %v1632_v3, %v1631_v24  ;;  %v754_v24 = vadd.s32 120, %v2328_v13 }
  0xeb   :  { %5048 = vst [vmem:[#allocation44_spill] sm:$0xff] %v2760_v2  ;;  %835 = vperm.xlu1 %2175, %v768_v22   ;;  %v756_v2 = vadd.s32 120, %v2342_v19 }
  0xec   :  { %2064 = vmatpush1.bf16.msra.mxu0 %v2063_v4  ;;  %2087 = vmatpush1.bf16.msra.mxu1 %v2063_v4  ;;  %v769_v4 = vadd.s32 120, %v2445_v62 }
  0xee   :  { %v2772_v22 = vpop.permute.xlu1 %332  ;;  %2198 = vset.pattern.permute.xlu0 %v5047_v40  ;;  %v2775_v42 = vpop.permute.xlu0 %335 }
  0xef   :  { %5049 = vst [vmem:[#allocation45_spill] sm:$0xff] %v2772_v22  ;;  %5050 = vst [vmem:[#allocation46_spill] sm:$0xff] %v2775_v42  ;;  %2176 = vset.pattern.permute.xlu1 %v5046_v9  ;;  %784 = vperm.xlu0 %2198, %v751_v34   ;;  %v5053_v42 = vmov 0.0|0.0   ;;  %v5054_v22 = vmov 5  }
  0xf0   :  { %1091 = vperm.xlu1 %2176, %v1024_v14   ;;  %2065 = vmatprep.subr.bf16.mxu0 %v5053_v42 }
  0xf1   :  { %2079 = vmatprep.subr.bf16.mxu1 %v5053_v42  ;;  %2067 = vmatpush1.bf16.msra.mxu0 %v2066_v35 }
  0xf2   :  { %v2785_v3 = vpop.permute.xlu1 %338  ;;  %v2787_v23 = vpop.permute.xlu0 %341  ;;  %2088 = vmatpush1.bf16.msra.mxu1 %v2066_v35  ;;  %2068 = vmatprep.subr.bf16.mxu0 %v5053_v42 }
  0xf3   :  { %5051 = vst [vmem:[#allocation47_spill] sm:$0xff] %v2785_v3  ;;  %5052 = vst [vmem:[#allocation48_spill] sm:$0xff] %v2787_v23  ;;  %793 = vperm.xlu0 %2198, %v754_v24   ;;  %2080 = vmatprep.subr.bf16.mxu1 %v5053_v42  ;;  %v1025_v24 = vadd.s32 130, %v2445_v62  ;;  %v1635_v62 = vld [vmem:[%s4924_s1 + $0x80] sm:$0xff] }
  0xf4   :  { %2177 = vset.pattern.permute.xlu1 %v5054_v22 }
  0xf5   :  { %1477 = vperm.xlu1 %2177, %v2403_v48  }
  0xf6   :  { %v2794_v34 = vpop.permute.xlu1 %344  ;;  %v2796_v14 = vpop.permute.xlu0 %347 }
  0xf7   :  { %5055 = vst [vmem:[#allocation49_spill] sm:$0xff] %v2794_v34  ;;  %5056 = vst [vmem:[#allocation50_spill] sm:$0xff] %v2796_v14  ;;  %799 = vperm.xlu0 %2198, %v756_v2   ;;  %v760_v14 = vadd.s32 120, %v2367_v31  ;;  %v771_v2 = vadd.s32 120, %v2463_v8 }
  0xf9   :  { %2178 = vset.pattern.permute.xlu1 %v5047_v40 }
  0xfa   :  { %v2803_v55 = vpop.permute.xlu1 %350  ;;  %838 = vperm.xlu1 %2178, %v769_v4   ;;  %v2805_v48 = vpop.permute.xlu0 %353 }
  0xfb   :  { %5057 = vst [vmem:[#allocation51_spill] sm:$0xff] %v2803_v55  ;;  %5058 = vst [vmem:[#allocation52_spill] sm:$0xff] %v2805_v48  ;;  %805 = vperm.xlu0 %2198, %v758_v12   ;;  %v1636_v12 = vld [vmem:[%s4924_s1 + $0x88] sm:$0x3f]  ;;  %v1011_v55 = vadd.s32 130, %v2344_v20  ;;  %v1012_v20 = vadd.s32 130, %v2342_v19 }
  0xfc   :  { %v1015_v19 = vadd.s32 130, %v2369_v32  ;;  %v1033_v32 = vadd.s32 130, %v2501_v39 }
  0xfe   :  { %v2809_v35 = vpop.permute.xlu1 %356  ;;  %2179 = vset.pattern.permute.xlu1 %v5046_v9  ;;  %v2812_v42 = vpop.permute.xlu0 %359 }
  0xff   :  { %5059 = vst [vmem:[#allocation53_spill] sm:$0xff] %v2809_v35  ;;  %5060 = vst [vmem:[#allocation54_spill] sm:$0xff] %v2812_v42  ;;  %1094 = vperm.xlu1 %2179, %v1025_v24   ;;  %811 = vperm.xlu0 %2198, %v760_v14   ;;  %v774_v14 = vadd.s32 120, %v2475_v17  ;;  %v2069_v24 = vpack.c.bf16 %v1636_v12, %v1635_v62  ;;  %v761_v35 = vadd.s32 120, %v2381_v38  ;;  %v762_v62 = vadd.s32 120, %v2379_v37 }
 0x101   :  { %2071 = vmatpush1.bf16.msk.msra.mxu0 %vm2070_vm2, %v2069_v24  ;;  %2089 = vmatpush1.bf16.msk.msra.mxu1 %vm2070_vm2, %v2069_v24 }
 0x102   :  { %v2815_v34 = vpop.permute.xlu1 %362  ;;  %v2817_v4 = vpop.permute.xlu0 %365 }
 0x103   :  { %5061 = vst [vmem:[#allocation55_spill] sm:$0xff] %v2815_v34  ;;  %5062 = vst [vmem:[#allocation56_spill] sm:$0xff] %v2817_v4  ;;  %2180 = vset.pattern.permute.xlu1 %v5054_v22  ;;  %844 = vperm.xlu0 %2198, %v771_v2   ;;  %v770_v34 = vadd.s32 120, %v2443_v61  ;;  %v1010_v61 = vadd.s32 130, %v2328_v13  ;;  %v764_v13 = vadd.s32 120, %v2391_v43 }
 0x104   :  { %1402 = vperm.xlu1 %2180, %v2313_v7  }
 0x107   :  { %v2829_v4 = vpop.permute.xlu1 %528  ;;  %v2831_v42 = vpop.permute.xlu0 %531  ;;  %853 = vperm.xlu0 %2198, %v774_v14  }
 0x108   :  { %2181 = vset.pattern.permute.xlu1 %v5047_v40 }
 0x109   :  { %841 = vperm.xlu1 %2181, %v770_v34   ;;  %v763_v34 = vadd.s32 120, %v2393_v44 }
 0x10b   :  { %v2835_v7 = vpop.permute.xlu1 %534  ;;  %v2837_v2 = vpop.permute.xlu0 %540  ;;  %814 = vperm.xlu0 %2198, %v761_v35  }
 0x10d   :  { %2182 = vset.pattern.permute.xlu1 %v5046_v9 }
 0x10e   :  { %1049 = vperm.xlu1 %2182, %v1010_v61  }
 0x10f   :  { %v2842_v12 = vpop.permute.xlu1 %537  ;;  %v2844_v14 = vpop.permute.xlu0 %546  ;;  %817 = vperm.xlu0 %2198, %v762_v62   ;;  %v765_v62 = vadd.s32 120, %v2409_v50 }
 0x112   :  { %2184 = vset.pattern.permute.xlu1 %v5054_v22 }
 0x113   :  { %v2848_v24 = vpop.permute.xlu1 %543  ;;  %v2850_v48 = vpop.permute.xlu0 %552  ;;  %1407 = vperm.xlu1 %2184, %v2295_v0   ;;  %820 = vperm.xlu0 %2198, %v763_v34   ;;  %v766_v0 = vadd.s32 120, %v2407_v49  ;;  %v1027_v34 = vadd.s32 130, %v2463_v8  ;;  %v773_v49 = vadd.s32 120, %v2477_v21 }
 0x114   :  { %5063 = vst [vmem:[#allocation57_spill] sm:$0xff] %v2850_v48 }
 0x117   :  { %v2854_v35 = vpop.permute.xlu1 %549  ;;  %v2856_v61 = vpop.permute.xlu0 %558  ;;  %1487 = vperm.xlu1 %2184, %v2421_v54   ;;  %823 = vperm.xlu0 %2198, %v764_v13  }
 0x118   :  { %5064 = vst [vmem:[#allocation58_spill] sm:$0xff] %v2854_v35 }
 0x11b   :  { %v2861_v3 = vpop.permute.xlu1 %555  ;;  %v2863_v23 = vpop.permute.xlu0 %564  ;;  %2185 = vset.pattern.permute.xlu1 %v5046_v9  ;;  %826 = vperm.xlu0 %2198, %v765_v62  }
 0x11c   :  { %5065 = vst [vmem:[#allocation59_spill] sm:$0xff] %v2861_v3  ;;  %1052 = vperm.xlu1 %2185, %v1011_v55   ;;  %v1029_v55 = vadd.s32 130, %v2477_v21 }
 0x11f   :  { %v2868_v48 = vpop.permute.xlu1 %561  ;;  %v2870_v54 = vpop.permute.xlu0 %570  ;;  %829 = vperm.xlu0 %2198, %v766_v0   ;;  %v772_v0 = vadd.s32 120, %v2461_v6 }
 0x120   :  { %5066 = vst [vmem:[#allocation60_spill] sm:$0xff] %v2868_v48  ;;  %1100 = vperm.xlu1 %2185, %v1027_v34  }
 0x123   :  { %v2873_v13 = vpop.permute.xlu1 %567  ;;  %v2875_v3 = vpop.permute.xlu0 %576  ;;  %2217 = vset.pattern.permute.xlu0 %v5046_v9 }
 0x124   :  { %5067 = vst [vmem:[#allocation61_spill] sm:$0xff] %v2873_v13  ;;  %2186 = vset.pattern.permute.xlu1 %v5054_v22  ;;  %1055 = vperm.xlu0 %2217, %v1012_v20   ;;  %v1028_v20 = vadd.s32 130, %v2461_v6  ;;  %v2222_v6 = vld [vmem:[%s4923_s0 + $0x20] sm:$0xff] }
 0x125   :  { %1492 = vperm.xlu1 %2186, %v2416_v53   ;;  %v1032_v53 = vadd.s32 130, %v2487_v28 }
 0x127   :  { %v2881_v8 = vpop.permute.xlu1 %573  ;;  %v2883_v62 = vpop.permute.xlu0 %582 }
 0x128   :  { %5068 = vst [vmem:[#allocation62_spill] sm:$0xff] %v2881_v8  ;;  %1106 = vperm.xlu0 %2217, %v1029_v55  }
 0x129   :  { %2187 = vset.pattern.permute.xlu1 %v5047_v40 }
 0x12a   :  { %847 = vperm.xlu1 %2187, %v772_v0  }
 0x12b   :  { %v2888_v34 = vpop.permute.xlu1 %579  ;;  %v2890_v13 = vpop.permute.xlu0 %588 }
 0x12c   :  { %1064 = vperm.xlu0 %2217, %v1015_v19   ;;  %v1034_v19 = vadd.s32 130, %v2499_v36 }
 0x12e   :  { %2188 = vset.pattern.permute.xlu1 %v5046_v9 }
 0x12f   :  { %v2895_v8 = vpop.permute.xlu1 %585  ;;  %v2897_v48 = vpop.permute.xlu0 %594  ;;  %1103 = vperm.xlu1 %2188, %v1028_v20  }
 0x130   :  { %5069 = vst [vmem:[#allocation63_spill] sm:$0xff] %v2897_v48  ;;  %1115 = vperm.xlu0 %2217, %v1032_v53  }
 0x133   :  { %v2900_v55 = vpop.permute.xlu1 %591  ;;  %v2902_v0 = vpop.permute.xlu0 %600  ;;  %2189 = vset.pattern.permute.xlu1 %v5054_v22 }
 0x134   :  { %5070 = vst [vmem:[#allocation64_spill] sm:$0xff] %v2902_v0  ;;  %1417 = vperm.xlu1 %2189, %v2222_v6   ;;  %1118 = vperm.xlu0 %2217, %v1033_v32   ;;  %v1035_v0 = vadd.s32 130, %v2513_v51  ;;  %v1013_v32 = vadd.s32 130, %v2357_v26  ;;  %v1036_v6 = vadd.s32 130, %v2511_v46  ;;  %v2223_v26 = vld [vmem:[%s4923_s0 + $0x28] sm:$0xff] }
 0x137   :  { %v2910_v20 = vpop.permute.xlu1 %597  ;;  %v2912_v53 = vpop.permute.xlu0 %606 }
 0x138   :  { %5071 = vst [vmem:[#allocation65_spill] sm:$0xff] %v2910_v20  ;;  %5072 = vst [vmem:[#allocation66_spill] sm:$0xff] %v2912_v53  ;;  %2190 = vset.pattern.permute.xlu1 %v5047_v40  ;;  %1121 = vperm.xlu0 %2217, %v1034_v19   ;;  %v1037_v19 = vadd.s32 130, %v2519_v63  ;;  %v1031_v20 = vadd.s32 130, %v2489_v29 }
 0x139   :  { %850 = vperm.xlu1 %2190, %v773_v49  }
 0x13b   :  { %v2916_v35 = vpop.permute.xlu1 %603  ;;  %v2918_v50 = vpop.permute.xlu0 %612 }
 0x13c   :  { %5073 = vst [vmem:[#allocation67_spill] sm:$0xff] %v2916_v35  ;;  %5074 = vst [vmem:[#allocation68_spill] sm:$0xff] %v2918_v50  ;;  %1124 = vperm.xlu0 %2217, %v1035_v0  }
 0x13d   :  { %2191 = vset.pattern.permute.xlu1 %v5046_v9 }
 0x13e   :  { %1058 = vperm.xlu1 %2191, %v1013_v32   ;;  %v1038_v32 = vadd.s32 130, %v2517_v58 }
 0x13f   :  { %v2923_v21 = vpop.permute.xlu1 %609  ;;  %v2925_v53 = vpop.permute.xlu0 %618 }
 0x140   :  { %5075 = vst [vmem:[#allocation69_spill] sm:$0xff] %v2923_v21  ;;  %5076 = vst [vmem:[#allocation70_spill] sm:$0xff] %v2925_v53  ;;  %1127 = vperm.xlu0 %2217, %v1036_v6   ;;  %v1014_v53 = vadd.s32 130, %v2355_v25 }
 0x142   :  { %2192 = vset.pattern.permute.xlu1 %v5054_v22 }
 0x143   :  { %v2929_v49 = vpop.permute.xlu1 %615  ;;  %1422 = vperm.xlu1 %2192, %v2223_v26  }
 0x144   :  { %5077 = vst [vmem:[#allocation71_spill] sm:$0xff] %v2929_v49  ;;  %v2934_v0 = vpop.permute.xlu0 %1040  ;;  %1130 = vperm.xlu0 %2217, %v1037_v19   ;;  %v1030_v19 = vadd.s32 130, %v2475_v17  ;;  %v76_v17 = vlaneseq }
 0x147   :  { %v2937_v50 = vpop.permute.xlu1 %621  ;;  %1502 = vperm.xlu1 %2192, %v2434_v59   ;;  %v2224_v59 = vld [vmem:[%s4923_s0 + $0x78] sm:$0xff] }
 0x148   :  { %5078 = vst [vmem:[#allocation72_spill] sm:$0xff] %v2937_v50  ;;  %v2940_v6 = vpop.permute.xlu0 %1043  ;;  %1133 = vperm.xlu0 %2217, %v1038_v32  }
 0x14b   :  { %2193 = vset.pattern.permute.xlu1 %v5046_v9 }
 0x14c   :  { %v2944_v49 = vpop.permute.xlu1 %787  ;;  %v2946_v21 = vpop.permute.xlu0 %1046  ;;  %1061 = vperm.xlu1 %2193, %v1014_v53   ;;  %2221 = vset.pattern.permute.xlu0 %v5054_v22  ;;  %v775_v53 = vadd.s32 120, %v2489_v29 }
 0x14d   :  { %1472 = vperm.xlu0 %2221, %v2224_v59   ;;  %v2969_v59 = vand.u32 127, %v76_v17 }
 0x14f   :  { %vm175_vm3 = vcmp.eq.s32.totalorder %v2969_v59, %v2559_v52  ;;  %vm367_vm4 = vcmp.eq.s32.totalorder %v2969_v59, %v2656_v57  ;;  %vm207_vm11 = vcmp.eq.s32.totalorder %v2969_v59, %v2607_v30  ;;  %vm399_vm13 = vcmp.eq.s32.totalorder %v2969_v59, %v2741_v60 }
 0x150   :  { %v2953_v26 = vpop.permute.xlu1 %790  ;;  %v2955_v25 = vpop.permute.xlu0 %1097  ;;  %1109 = vperm.xlu1 %2193, %v1030_v19   ;;  %vm2994_vm9 = vmor %vm175_vm3, %vm367_vm4  ;;  %vm655_vm4 = vcmp.eq.s32.totalorder %v2969_v59, %v2875_v3 }
 0x154   :  { %v2957_v32 = vpop.permute.xlu1 %796  ;;  %2194 = vset.pattern.permute.xlu1 %v5054_v22 }
 0x155   :  { %v2960_v50 = vpop.permute.xlu0 %1397  ;;  %1507 = vperm.xlu1 %2194, %v2457_v5   ;;  %v2977_v5 = vadd.s32 128, %v2969_v59 }
 0x157   :  { %vm176_vm5 = vcmp.eq.s32.totalorder %v2977_v5, %v2559_v52  ;;  %vm368_vm6 = vcmp.eq.s32.totalorder %v2977_v5, %v2656_v57  ;;  %vm178_vm7 = vcmp.eq.s32.totalorder %v2977_v5, %v2565_v15  ;;  %vm370_vm8 = vcmp.eq.s32.totalorder %v2977_v5, %v2654_v41 }
 0x158   :  { %v2964_v35 = vpop.permute.xlu1 %802  ;;  %vm402_vm10 = vcmp.eq.s32.totalorder %v2977_v5, %v2744_v56  ;;  %vm3002_vm12 = vmor %vm176_vm5, %vm368_vm6  ;;  %vm210_vm14 = vcmp.eq.s32.totalorder %v2977_v5, %v2605_v33  ;;  %vm208_vm15 = vcmp.eq.s32.totalorder %v2977_v5, %v2607_v30  ;;  %vm400_vm0 = vcmp.eq.s32.totalorder %v2977_v5, %v2741_v60 }
 0x159   :  { %5079 = vst [vmem:[#allocation73_spill] sm:$0xff] %v2964_v35  ;;  %v2966_v58 = vpop.permute.xlu0 %1482  ;;  %2195 = vset.pattern.permute.xlu1 %v5047_v40  ;;  %vm3015_vm1 = vmor %vm178_vm7, %vm370_vm8  ;;  %v5085_v57 = vmov 0  ;;  %vm624_vm3 = vcmp.eq.s32.totalorder %v2977_v5, %v2829_v4  ;;  %v776_v60 = vadd.s32 120, %v2487_v28  ;;  %vm656_vm6 = vcmp.eq.s32.totalorder %v2977_v5, %v2875_v3 }
 0x15a   :  { %856 = vperm.xlu1 %2195, %v775_v53   ;;  %v5086_v57 = vsel %vm3015_vm1, 4294967295, %v5085_v57  ;;  %vm3024_vm2 = vmor %vm210_vm14, %vm402_vm10  ;;  %vm177_vm7 = vcmp.eq.s32.totalorder %v2969_v59, %v2565_v15  ;;  %vm369_vm8 = vcmp.eq.s32.totalorder %v2969_v59, %v2654_v41  ;;  %v5089_v28 = vmov 0 }
 0x15b   :  { %vm463_vm5 = vmor %vm207_vm11, %vm399_vm13  ;;  %v5091_v15 = vmov 0  ;;  %v1016_v52 = vadd.s32 130, %v2367_v31  ;;  %v5100_v31 = vmov 0  ;;  %v5103_v53 = vmov 0 }
 0x15c   :  { %v2971_v19 = vpop.permute.xlu1 %808  ;;  %vm464_vm10 = vmor %vm208_vm15, %vm400_vm0  ;;  %vm623_vm15 = vcmp.eq.s32.totalorder %v2969_v59, %v2829_v4 }
 0x15d   :  { %5080 = vst [vmem:[#allocation74_spill] sm:$0xff] %v2971_v19  ;;  %v2974_v48 = vpop.permute.xlu0 %1412  ;;  %vm3046_vm1 = vmor %vm463_vm5, %vm655_vm4  ;;  %vm658_vm4 = vcmp.eq.s32.totalorder %v2977_v5, %v2888_v34 }
 0x15e   :  { %2196 = vset.pattern.permute.xlu1 %v5046_v9  ;;  %v5090_v28 = vsel %vm3046_vm1, 4294967295, %v5089_v28  ;;  %vm3056_vm13 = vmor %vm3002_vm12, %vm624_vm3  ;;  %vm626_vm12 = vcmp.eq.s32.totalorder %v2977_v5, %v2831_v42 }
 0x15f   :  { %1112 = vperm.xlu1 %2196, %v1031_v20   ;;  %v2225_v20 = vld [vmem:[%s4923_s0 + $0x38] sm:$0xff]  ;;  %v5092_v15 = vsel %vm3056_vm13, 4294967295, %v5091_v15  ;;  %vm720_vm0 = vmor %vm464_vm10, %vm656_vm6  ;;  %vm372_vm10 = vcmp.eq.s32.totalorder %v2977_v5, %v2660_v27 }
 0x160   :  { %v833_v17 = vpop.permute.xlu1 %832  ;;  %vm3066_vm5 = vmor %vm177_vm7, %vm369_vm8 }
 0x161   :  { %v2988_v29 = vpop.permute.xlu0 %1497  ;;  %vm912_vm14 = vcmp.eq.s32.totalorder %v2977_v5, %v833_v17  ;;  %vm911_vm3 = vcmp.eq.s32.totalorder %v2969_v59, %v833_v17  ;;  %vm3076_vm6 = vmor %vm3024_vm2, %vm658_vm4  ;;  %vm625_vm2 = vcmp.eq.s32.totalorder %v2969_v59, %v2831_v42 }
 0x162   :  { %vm976_vm13 = vmor %vm720_vm0, %vm912_vm14  ;;  %vm5099_vm14 = vnez %v5086_v57  ;;  %vm401_vm0 = vcmp.eq.s32.totalorder %v2969_v59, %v2744_v56  ;;  %v5105_v56 = vmov 0  ;;  %v5107_v57 = vmov 0 }
 0x163   :  { %2197 = vset.pattern.permute.xlu1 %v5054_v22  ;;  %vm3083_vm8 = vmor %vm2994_vm9, %vm623_vm15  ;;  %vm5102_vm9 = vnez %v5090_v28  ;;  %v2226_v28 = vld [vmem:[%s4923_s0 + $0x40] sm:$0xff] }
 0x164   :  { %1432 = vperm.xlu1 %2197, %v2225_v20   ;;  %v5097_v20 = vmov 0  ;;  %vm975_vm15 = vmor %vm5102_vm9, %vm911_vm3 }
 0x165   :  { %v1089_v19 = vpop.permute.xlu1 %1088  ;;  %v3022_v63 = vpop.permute.xlu0 %1427  ;;  %v5098_v20 = vsel %vm3083_vm8, 4294967295, %v5097_v20 }
 0x166   :  { %vm1168_vm11 = vcmp.eq.s32.totalorder %v2977_v5, %v1089_v19  ;;  %vm1167_vm7 = vcmp.eq.s32.totalorder %v2969_v59, %v1089_v19 }
 0x167   :  { %vm1232_vm1 = vmor %vm976_vm13, %vm1168_vm11  ;;  %vm5004_vm13 = vcmp.eq.s32.totalorder %v2977_v5, 141 }
 0x168   :  { %2199 = vset.pattern.permute.xlu1 %v5047_v40  ;;  %vm3091_vm11 = vmor %vm5099_vm14, %vm626_vm12  ;;  %vm180_vm12 = vcmp.eq.s32.totalorder %v2977_v5, %v2557_v45  ;;  %vm1136_vm14 = vcmp.eq.s32.totalorder %v2977_v5, %v2934_v0 }
 0x169   :  { %v3052_v3 = vpop.permute.xlu0 %1512  ;;  %859 = vperm.xlu1 %2199, %v776_v60   ;;  %v5101_v31 = vsel %vm3091_vm11, 4294967295, %v5100_v31  ;;  %vm3107_vm4 = vmor %vm1232_vm1, %vm5004_vm13  ;;  %vm209_vm1 = vcmp.eq.s32.totalorder %v2969_v59, %v2605_v33  ;;  %v5157_v60 = vmov 0  ;;  %v5202_v33 = vmov 0 }
 0x16a   :  { %v3064_v41 = vpop.permute.xlu1 %835  ;;  %v5104_v53 = vsel %vm3107_vm4, 4294967295, %v5103_v53  ;;  %vm3118_vm9 = vmor %vm975_vm15, %vm1167_vm7 }
 0x16b   :  { %v5106_v56 = vsel %vm3118_vm9, 4294967295, %v5105_v56  ;;  %vm3127_vm13 = vmor %vm180_vm12, %vm372_vm10  ;;  %vm5109_vm11 = vcmp.eq.s32.totalorder %v2977_v5, %v3064_v41  ;;  %vm5112_vm10 = vnez %v5092_v15 }
 0x16c   :  { %v5108_v57 = vsel %vm3127_vm13, 4294967295, %v5107_v57  ;;  %vm978_vm7 = vmor %vm3076_vm6, %vm5109_vm11  ;;  %vm5005_vm13 = vcmp.eq.s32.totalorder %v2977_v5, 140  ;;  %vm5006_vm6 = vcmask 113664  }
 0x16d   :  { %2200 = vset.pattern.permute.xlu1 %v5046_v9  ;;  %vm3140_vm9 = vmor %vm209_vm1, %vm401_vm0  ;;  %vm882_vm0 = vcmp.eq.s32.totalorder %v2977_v5, %v2944_v49  ;;  %vm5118_vm1 = vcmp.eq.s32.totalorder %v2977_v5, 141 }
 0x16e   :  { %1067 = vperm.xlu1 %2200, %v1016_v52   ;;  %v785_v35 = vpop.permute.xlu0 %784  ;;  %vm3157_vm11 = vmor %vm3066_vm5, %vm625_vm2  ;;  %v2273_v52 = vmov 0.0   ;;  %vm179_vm5 = vcmp.eq.s32.totalorder %v2969_v59, %v2557_v45  ;;  %vm371_vm2 = vcmp.eq.s32.totalorder %v2969_v59, %v2660_v27 }
 0x16f   :  { %v3103_v17 = vpop.permute.xlu1 %1091  ;;  %vm880_vm3 = vcmp.eq.s32.totalorder %v2977_v5, %v785_v35  ;;  %vm879_vm8 = vcmp.eq.s32.totalorder %v2969_v59, %v785_v35 }
 0x170   :  { %vm1170_vm15 = vcmp.eq.s32.totalorder %v2977_v5, %v3103_v17  ;;  %vm944_vm12 = vmor %vm5112_vm10, %vm880_vm3  ;;  %vm1135_vm10 = vcmp.eq.s32.totalorder %v2969_v59, %v2934_v0 }
 0x171   :  { %vm3148_vm4 = vmor %vm944_vm12, %vm1136_vm14  ;;  %vm5117_vm14 = vnez %v5104_v53  ;;  %vm5119_vm12 = vnez %v5098_v20  ;;  %v5275_v53 = vmov 0 }
 0x172   :  { %2201 = vset.pattern.permute.xlu1 %v5054_v22  ;;  %v3153_v19 = vpop.permute.xlu0 %793  ;;  %vm1234_vm3 = vmor %vm978_vm7, %vm1170_vm15  ;;  %v1362_v4 = vsel %vm5117_vm14, 1.0, %v2273_v52 }
 0x173   :  { %1437 = vperm.xlu1 %2201, %v2226_v28   ;;  %vm1300_vm7 = vmor %vm1234_vm3, %vm5118_vm1  ;;  %vm5122_vm3 = vnez %v5106_v56  ;;  %vm657_vm1 = vcmp.eq.s32.totalorder %v2969_v59, %v2888_v34  ;;  %v5200_v34 = vld [vmem:[#allocation19_spill] sm:$0xff] }
 0x174   :  { %v1478_v15 = vpop.permute.xlu1 %1477  ;;  %vm3185_vm14 = vmor %vm5119_vm12, %vm879_vm8  ;;  %v1361_v28 = vsel %vm5122_vm3, 1.0, %v2273_v52  ;;  %vm628_vm8 = vcmp.eq.s32.totalorder %v2977_v5, %v2835_v7  ;;  %vm5123_vm12 = vnez %v5101_v31  ;;  %v2227_v31 = vld [vmem:[%s4923_s0 + $0xc0] sm:$0xff] }
 0x175   :  { %v1588_v30 = vsel %vm5005_vm13, %v1478_v15, %v1362_v4  ;;  %v1364_v15 = vsel %vm1300_vm7, 1.0, %v2273_v52  ;;  %vm3205_vm15 = vmor %vm5123_vm12, %vm882_vm0  ;;  %v5126_v4 = vld [vmem:[#allocation34_spill] sm:$0xff]  ;;  %vm5127_vm0 = vcmp.eq.s32.totalorder %v2977_v5, 141 }
 0x176   :  { %2028 = vmatprep.mubr.msk.f32.mxu1 %vm5006_vm6, %v1588_v30  ;;  %v3209_v35 = vpop.permute.xlu0 %799  ;;  %v1590_v56 = vsel %vm5005_vm13, %v2966_v58, %v1364_v15  ;;  %vm1266_vm12 = vmor %vm3148_vm4, %vm5127_vm0  ;;  %vm373_vm7 = vcmp.eq.s32.totalorder %v2969_v59, %v5126_v4  ;;  %v777_v30 = vadd.s32 120, %v2501_v39  ;;  %vm881_vm0 = vcmp.eq.s32.totalorder %v2969_v59, %v2944_v49 }
 0x177   :  { %1883 = vmatmul.mubr.f32.vlgmr.msra.gmra.mrb[0].mxu1 %v1361_v28  ;;  %1517 = vperm.xlu1 %2201, %v2227_v31   ;;  %v1330_v58 = vsel %vm1266_vm12, 1.0, %v2273_v52  ;;  %vm1199_vm4 = vmor %vm3185_vm14, %vm1135_vm10  ;;  %v5128_v28 = vld [vmem:[#allocation21_spill] sm:$0xff]  ;;  %vm5131_vm14 = vnez %v5108_v57  ;;  %v5153_v49 = vmov 0  ;;  %v1018_v15 = vadd.s32 130, %v2379_v37 }
 0x178   :  { %2029 = vmatprep.mubr.msk.f32.mxu1 %vm5006_vm6, %v1590_v56  ;;  %vm3249_vm12 = vmor %vm179_vm5, %vm371_vm2  ;;  %v1556_v45 = vsel %vm5005_vm13, %v2960_v50, %v1330_v58  ;;  %vm5134_vm5 = vcmp.eq.s32.totalorder %v2977_v5, %v5126_v4  ;;  %vm5135_vm2 = vcmp.eq.s32.totalorder %v2977_v5, %v2563_v10  ;;  %v1329_v0 = vsel %vm1199_vm4, 1.0, %v2273_v52  ;;  %v5160_v56 = vld [vmem:[#allocation17_spill] sm:$0xff]  ;;  %v2228_v50 = vld [vmem:[%s4923_s0 + $0x48] sm:$0xff] }
 0x179   :  { %v3238_v42 = vpop.permute.xlu1 %838  ;;  %vm3260_vm3 = vmor %vm5131_vm14, %vm628_vm8  ;;  %vm388_vm8 = vcmp.eq.s32.totalorder %v2977_v5, %v2699_v11  ;;  %2012 = vmatprep.mubr.msk.f32.mxu0 %vm5006_vm6, %v1556_v45  ;;  %vm5174_vm4 = vcmp.eq.s32.totalorder %v2969_v59, %v2713_v47 }
 0x17a   :  { %vm3275_vm10 = vmor %vm5135_vm2, %vm5134_vm5  ;;  %vm913_vm5 = vcmp.eq.s32.totalorder %v2969_v59, %v3064_v41  ;;  %v3296_v57 = vpop.permute.xlu0 %805  ;;  %vm5140_vm2 = vcmp.eq.s32.totalorder %v2969_v59, %v2563_v10  ;;  %1803 = vmatmul.mubr.f32.vlgmr.msra.gmra.mrb[0].mxu0 %v1329_v0  ;;  %v5223_v41 = vmov 0 }
 0x17b   :  { %vm3288_vm13 = vmor %vm3140_vm9, %vm657_vm1  ;;  %vm5143_vm9 = vcmp.eq.s32.totalorder %v2977_v5, %v2940_v6  ;;  %2202 = vset.pattern.permute.xlu1 %v5047_v40 }
 0x17c   :  { %vm3304_vm14 = vmor %vm5140_vm2, %vm373_vm7  ;;  %vm5146_vm7 = vcmp.eq.s32.totalorder %v2969_v59, %v2699_v11  ;;  %vm5147_vm2 = vcmp.eq.s32.totalorder %v2969_v59, %v2589_v16  ;;  %862 = vperm.xlu1 %2202, %v777_v30   ;;  %v1017_v11 = vadd.s32 130, %v2381_v38  ;;  %v5180_v30 = vmov 0 }
 0x17d   :  { %vm3313_vm1 = vmor %vm3205_vm15, %vm5143_vm9 }
 0x17e   :  { %vm3326_vm6 = vmor %vm5147_vm2, %vm5146_vm7  ;;  %vm5152_vm7 = vcmp.eq.s32.totalorder %v2977_v5, %v2589_v16  ;;  %v3370_v16 = vpop.permute.xlu1 %1094  ;;  %v3378_v20 = vpop.permute.xlu0 %811 }
 0x17f   :  { %vm3335_vm15 = vmor %vm3157_vm11, %vm881_vm0  ;;  %vm5155_vm11 = vcmp.eq.s32.totalorder %v2977_v5, %v2756_v18  ;;  %vm5156_vm0 = vcmp.eq.s32.totalorder %v2977_v5, %v5128_v28 }
 0x180   :  { %vm3349_vm2 = vmor %vm5152_vm7, %vm388_vm8  ;;  %2203 = vset.pattern.permute.xlu1 %v5046_v9 }
 0x181   :  { %v5154_v49 = vsel %vm3349_vm2, 4294967295, %v5153_v49  ;;  %vm3359_vm9 = vmor %vm5156_vm0, %vm5155_vm11  ;;  %vm5159_vm11 = vcmp.eq.s32.totalorder %v2969_v59, %v3103_v17  ;;  %1070 = vperm.xlu1 %2203, %v1017_v11   ;;  %v5226_v17 = vmov 0 }
 0x182   :  { %v5158_v60 = vsel %vm3359_vm9, 4294967295, %v5157_v60  ;;  %vm977_vm8 = vmor %vm3288_vm13, %vm913_vm5  ;;  %vm627_vm13 = vcmp.eq.s32.totalorder %v2969_v59, %v2835_v7  ;;  %vm5161_vm5 = vcmp.eq.s32.totalorder %v2977_v5, 141  ;;  %vm5165_vm9 = vcmp.eq.s32.totalorder %v2969_v59, %v5128_v28  ;;  %v3448_v4 = vpop.permute.xlu0 %844 }
 0x183   :  { %vm1233_vm0 = vmor %vm977_vm8, %vm5159_vm11  ;;  %v5166_v7 = vmov 0  ;;  %vm5175_vm11 = vcmp.eq.s32.totalorder %v2969_v59, %v5160_v56  ;;  %v1403_v31 = vpop.permute.xlu1 %1402  ;;  %v5253_v28 = vmov 0 }
 0x184   :  { %v1363_v38 = vsel %vm1233_vm0, 1.0, %v2273_v52  ;;  %vm3391_vm7 = vmor %vm3313_vm1, %vm5161_vm5  ;;  %vm5164_vm0 = vcmp.eq.s32.totalorder %v2969_v59, %v2756_v18  ;;  %vm5168_vm1 = vcmp.eq.s32.totalorder %v2977_v5, %v2953_v26  ;;  %v5236_v18 = vld [vmem:[#allocation45_spill] sm:$0xff] }
 0x185   :  { %vm3407_vm2 = vmor %vm5165_vm9, %vm5164_vm0  ;;  %1888 = vmatmul.mubr.f32.gmra.mrb[2].mxu1 %v1363_v38  ;;  %vm1140_vm9 = vcmp.eq.s32.totalorder %v2977_v5, %v2946_v21  ;;  %vm5171_vm0 = vcmp.eq.s32.totalorder %v2969_v59, %v2940_v6  ;;  %v5176_v6 = vmov 0  ;;  %v1332_v58 = vsel %vm3391_vm7, 1.0, %v2273_v52  ;;  %2204 = vset.pattern.permute.xlu1 %v5054_v22 }
 0x186   :  { %v5167_v7 = vsel %vm3407_vm2, 4294967295, %v5166_v7  ;;  %vm3416_vm5 = vmor %vm3260_vm3, %vm5168_vm1  ;;  %vm643_vm1 = vcmp.eq.s32.totalorder %v2969_v59, %v2856_v61  ;;  %1442 = vperm.xlu1 %2204, %v2228_v50   ;;  %v3523_v0 = vpop.permute.xlu0 %853  ;;  %v5219_v38 = vmov 0 }
 0x187   :  { %vm1201_vm8 = vmor %vm3335_vm15, %vm5171_vm0  ;;  %vm5178_vm15 = vcmp.eq.s32.totalorder %v2977_v5, %v2713_v47  ;;  %vm5182_vm0 = vcmp.eq.s32.totalorder %v2977_v5, %v2842_v12 }
 0x188   :  { %vm3432_vm3 = vmor %vm3249_vm12, %vm627_vm13  ;;  %vm644_vm12 = vcmp.eq.s32.totalorder %v2977_v5, %v2856_v61  ;;  %vm5179_vm13 = vcmp.eq.s32.totalorder %v2977_v5, %v5160_v56  ;;  %v1331_v39 = vsel %vm1201_vm8, 1.0, %v2273_v52  ;;  %v3547_v10 = vpop.permute.xlu1 %841  ;;  %vm5208_vm8 = vnez %v5167_v7  ;;  %v5216_v56 = vld [vmem:[#allocation44_spill] sm:$0xff] }
 0x189   :  { %vm3444_vm2 = vmor %vm5175_vm11, %vm5174_vm4  ;;  %vm660_vm11 = vcmp.eq.s32.totalorder %v2977_v5, %v2883_v62  ;;  %v778_v7 = vadd.s32 120, %v2499_v36  ;;  %v779_v36 = vadd.s32 120, %v2513_v51  ;;  %v5383_v51 = vld [vmem:[#allocation58_spill] sm:$0xff] }
 0x18a   :  { %v5177_v6 = vsel %vm3444_vm2, 4294967295, %v5176_v6  ;;  %vm3461_vm4 = vmor %vm5179_vm13, %vm5178_vm15  ;;  %vm5185_vm2 = vcmp.eq.s32.totalorder %v2977_v5, 140  ;;  %vm5188_vm13 = vcmp.eq.s32.totalorder %v2969_v59, %v2842_v12  ;;  %v5195_v12 = vmov 0  ;;  %v815_v11 = vpop.permute.xlu0 %814 }
 0x18b   :  { %v5181_v30 = vsel %vm3461_vm4, 4294967295, %v5180_v30  ;;  %vm3472_vm7 = vmor %vm3275_vm10, %vm5182_vm0  ;;  %v1558_v47 = vsel %vm5185_vm2, %v1403_v31, %v1332_v58  ;;  %vm5191_vm10 = vcmask 113664   ;;  %vm5207_vm0 = vcmp.eq.s32.totalorder %v2969_v59, %v2883_v62  ;;  %v5296_v58 = vld [vmem:[#allocation35_spill] sm:$0xff] }
 0x18c   :  { %vm3480_vm15 = vmor %vm3416_vm5, %vm1140_vm9  ;;  %2013 = vmatprep.mubr.msk.f32.mxu0 %vm5191_vm10, %v1558_v47  ;;  %vm5201_vm10 = vcmp.eq.s32.totalorder %v2977_v5, 141  ;;  %v5249_v47 = vmov 0 }
 0x18d   :  { %vm3489_vm4 = vmor %vm3304_vm14, %vm5188_vm13  ;;  %1808 = vmatmul.mubr.f32.gmra.mrb[2].mxu0 %v1331_v39  ;;  %vm5194_vm14 = vnez %v5154_v49  ;;  %vm395_vm13 = vcmp.eq.s32.totalorder %v2969_v59, %v2726_v1  ;;  %v1050_v31 = vpop.permute.xlu1 %1049  ;;  %v5356_v39 = vld [vmem:[#allocation25_spill] sm:$0xff] }
 0x18e   :  { %vm3497_vm2 = vmor %vm3326_vm6, %vm643_vm1  ;;  %vm5197_vm6 = vnez %v5158_v60  ;;  %v2229_v60 = vld [vmem:[%s4923_s0 + $0xc8] sm:$0xff]  ;;  %v3680_v61 = vpop.permute.xlu0 %817 }
 0x18f   :  { %vm3506_vm9 = vmor %vm5194_vm14, %vm644_vm12  ;;  %vm203_vm12 = vcmp.eq.s32.totalorder %v2969_v59, %v5200_v34  ;;  %1522 = vperm.xlu1 %2204, %v2229_v60  }
 0x190   :  { %v5196_v12 = vsel %vm3506_vm9, 4294967295, %v5195_v12  ;;  %vm3514_vm1 = vmor %vm5197_vm6, %vm660_vm11  ;;  %vm1172_vm11 = vcmp.eq.s32.totalorder %v2977_v5, %v3370_v16  ;;  %vm5228_vm6 = vcmp.eq.s32.totalorder %v2977_v5, %v2863_v23 }
 0x191   :  { %vm3535_vm14 = vmor %vm3480_vm15, %vm5201_vm10  ;;  %vm5204_vm15 = vcmp.eq.s32.totalorder %v2969_v59, %v2953_v26 }
 0x192   :  { %v5203_v33 = vsel %vm3535_vm14, 4294967295, %v5202_v33  ;;  %vm3554_vm10 = vmor %vm3432_vm3, %vm5204_vm15  ;;  %vm886_vm14 = vcmp.eq.s32.totalorder %v2977_v5, %v3153_v19  ;;  %vm5211_vm3 = vcmp.eq.s32.totalorder %v2977_v5, %v3238_v42  ;;  %v821_v27 = vpop.permute.xlu0 %820 }
 0x193   :  { %vm3565_vm5 = vmor %vm5208_vm8, %vm5207_vm0  ;;  %vm5217_vm0 = vcmp.eq.s32.totalorder %v2969_v59, %v2863_v23  ;;  %v5235_v23 = vld [vmem:[#allocation23_spill] sm:$0xff]  ;;  %2205 = vset.pattern.permute.xlu1 %v5047_v40 }
 0x194   :  { %vm980_vm15 = vmor %vm3514_vm1, %vm5211_vm3  ;;  %vm5222_vm3 = vcmp.eq.s32.totalorder %v2977_v5, %v5200_v34  ;;  %vm899_vm1 = vcmp.eq.s32.totalorder %v2969_v59, %v815_v11  ;;  %865 = vperm.xlu1 %2205, %v778_v7   ;;  %v5267_v34 = vmov 0 }
 0x195   :  { %vm3576_vm9 = vmor %vm203_vm12, %vm395_vm13  ;;  %vm5218_vm12 = vnez %v5177_v6 }
 0x196   :  { %vm3582_vm8 = vmor %vm980_vm15, %vm1172_vm11  ;;  %vm5221_vm11 = vcmp.eq.s32.totalorder %v2977_v5, %v2726_v1  ;;  %v5230_v1 = vmov 0  ;;  %v3783_v60 = vpop.permute.xlu0 %823 }
 0x197   :  { %vm3596_vm13 = vmor %vm5218_vm12, %vm5217_vm0  ;;  %vm5225_vm0 = vcmp.eq.s32.totalorder %v2969_v59, %v2946_v21  ;;  %v5234_v21 = vld [vmem:[#allocation20_spill] sm:$0xff] }
 0x198   :  { %v5220_v38 = vsel %vm3596_vm13, 4294967295, %v5219_v38  ;;  %vm3606_vm15 = vmor %vm5222_vm3, %vm5221_vm11  ;;  %vm5229_vm11 = vnez %v5181_v30  ;;  %v5246_v30 = vmov 0  ;;  %2206 = vset.pattern.permute.xlu1 %v5046_v9 }
 0x199   :  { %v5224_v41 = vsel %vm3606_vm15, 4294967295, %v5223_v41  ;;  %vm3617_vm12 = vmor %vm3554_vm10, %vm5225_vm0  ;;  %vm900_vm10 = vcmp.eq.s32.totalorder %v2977_v5, %v815_v11  ;;  %vm214_vm0 = vcmp.eq.s32.totalorder %v2977_v5, %v5234_v21  ;;  %1073 = vperm.xlu1 %2206, %v1018_v15  }
 0x19a   :  { %v5227_v17 = vsel %vm3617_vm12, 4294967295, %v5226_v17  ;;  %vm3626_vm3 = vmor %vm5229_vm11, %vm5228_vm6  ;;  %vm5243_vm11 = vcmp.eq.s32.totalorder %v2977_v5, %v5216_v56  ;;  %vm5252_vm6 = vcmp.eq.s32.totalorder %v2977_v5, %v5235_v23 }
 0x19b   :  { %v5231_v1 = vsel %vm3626_vm3, 4294967295, %v5230_v1  ;;  %vm3635_vm13 = vmor %vm3472_vm7, %vm886_vm14  ;;  %vm5237_vm3 = vcmp.eq.s32.totalorder %v2969_v59, %v3153_v19  ;;  %vm5240_vm14 = vcmp.eq.s32.totalorder %v2977_v5, 141  ;;  %v5299_v19 = vld [vmem:[#allocation12_spill] sm:$0xff] }
 0x19c   :  { %vm3651_vm7 = vmor %vm3489_vm4, %vm5237_vm3 }
 0x19d   :  { %vm3659_vm12 = vmor %vm3582_vm8, %vm5240_vm14  ;;  %vm1142_vm8 = vcmp.eq.s32.totalorder %v2977_v5, %v1050_v31  ;;  %vm5251_vm14 = vcmp.eq.s32.totalorder %v2977_v5, %v5236_v18  ;;  %2207 = vset.pattern.permute.xlu1 %v5054_v22 }
 0x19e   :  { %vm3668_vm15 = vmor %vm214_vm0, %vm5243_vm11  ;;  %vm5248_vm0 = vnez %v5196_v12  ;;  %v1408_v12 = vpop.permute.xlu1 %1407  ;;  %v1366_v62 = vsel %vm3659_vm12, 1.0, %v2273_v52  ;;  %vm5279_vm12 = vcmp.eq.s32.totalorder %v2977_v5, 140 }
 0x19f   :  { %vm3674_vm4 = vmor %vm3497_vm2, %vm899_vm1  ;;  %vm213_vm2 = vcmp.eq.s32.totalorder %v2969_v59, %v5234_v21  ;;  %vm651_vm1 = vcmp.eq.s32.totalorder %v2969_v59, %v2870_v54 }
 0x1a0   :  { %v5247_v30 = vsel %vm3674_vm4, 4294967295, %v5246_v30  ;;  %vm3686_vm11 = vmor %vm5248_vm0, %vm900_vm10  ;;  %vm1171_vm10 = vcmp.eq.s32.totalorder %v2969_v59, %v3370_v16  ;;  %vm5255_vm4 = vcmp.eq.s32.totalorder %v2969_v59, %v5216_v56  ;;  %v2230_v56 = vld [vmem:[%s4923_s0 + $0x50] sm:$0xff] }
 0x1a1   :  { %v5250_v47 = vsel %vm3686_vm11, 4294967295, %v5249_v47  ;;  %vm3700_vm3 = vmor %vm5252_vm6, %vm5251_vm14  ;;  %vm652_vm6 = vcmp.eq.s32.totalorder %v2977_v5, %v2870_v54  ;;  %vm5258_vm14 = vcmp.eq.s32.totalorder %v2977_v5, 141  ;;  %1447 = vperm.xlu1 %2207, %v2230_v56   ;;  %v5309_v54 = vld [vmem:[#allocation46_spill] sm:$0xff] }
 0x1a2   :  { %v5254_v28 = vsel %vm3700_vm3, 4294967295, %v5253_v28  ;;  %vm1206_vm0 = vmor %vm3635_vm13, %vm1142_vm8  ;;  %vm5259_vm13 = vnez %v5203_v33  ;;  %v5270_v33 = vmov 0  ;;  %v1488_v26 = vpop.permute.xlu1 %1487 }
 0x1a3   :  { %vm3712_vm11 = vmor %vm213_vm2, %vm5255_vm4  ;;  %v1334_v37 = vsel %vm5259_vm13, 1.0, %v2273_v52  ;;  %vm5260_vm4 = vcmp.eq.s32.totalorder %v2969_v59, %v3238_v42  ;;  %vm904_vm13 = vcmp.eq.s32.totalorder %v2977_v5, %v821_v27 }
 0x1a4   :  { %vm1272_vm3 = vmor %vm1206_vm0, %vm5258_vm14  ;;  %vm5263_vm0 = vcmp.eq.s32.totalorder %v2977_v5, 140  ;;  %vm903_vm14 = vcmp.eq.s32.totalorder %v2969_v59, %v821_v27  ;;  %v5308_v27 = vld [vmem:[#allocation9_spill] sm:$0xff] }
 0x1a5   :  { %v1336_v45 = vsel %vm1272_vm3, 1.0, %v2273_v52  ;;  %vm979_vm8 = vmor %vm3565_vm5, %vm5260_vm4  ;;  %v1560_v50 = vsel %vm5263_vm0, %v1408_v12, %v1334_v37  ;;  %vm662_vm4 = vcmp.eq.s32.totalorder %v2977_v5, %v2895_v8  ;;  %vm5269_vm0 = vnez %v5220_v38  ;;  %v5359_v12 = vld [vmem:[#allocation8_spill] sm:$0xff] }
 0x1a6   :  { %vm3731_vm2 = vmor %vm3576_vm9, %vm651_vm1  ;;  %vm5266_vm9 = vnez %v5224_v41  ;;  %v827_v41 = vpop.permute.xlu0 %826  ;;  %v3821_v7 = vpop.permute.xlu1 %1052 }
 0x1a7   :  { %vm3744_vm5 = vmor %vm979_vm8, %vm1171_vm10  ;;  %vm5272_vm10 = vcmask 113664   ;;  %vm5273_vm8 = vnez %v5227_v17  ;;  %v5284_v17 = vmov 0 }
 0x1a8   :  { %vm3750_vm1 = vmor %vm5266_vm9, %vm652_vm6  ;;  %2014 = vmatprep.mubr.msk.f32.mxu0 %vm5272_vm10, %v1560_v50  ;;  %v1333_v16 = vsel %vm5273_vm8, 1.0, %v2273_v52  ;;  %vm918_vm6 = vcmp.eq.s32.totalorder %v2977_v5, %v3547_v10  ;;  %vm5274_vm9 = vnez %v5231_v1  ;;  %v1365_v38 = vsel %vm3744_vm5, 1.0, %v2273_v52  ;;  %v2231_v1 = vld [vmem:[%s4923_s0 + $0xd0] sm:$0xff] }
 0x1a9   :  { %v5268_v34 = vsel %vm3750_vm1, 4294967295, %v5267_v34  ;;  %vm3758_vm3 = vmor %vm5269_vm0, %vm903_vm14  ;;  %1813 = vmatmul.mubr.f32.gmra.mrb[4].mxu0 %v1333_v16  ;;  %vm5277_vm14 = vcmp.eq.s32.totalorder %v2977_v5, 140  ;;  %vm664_vm0 = vcmp.eq.s32.totalorder %v2977_v5, %v2890_v13  ;;  %1527 = vperm.xlu1 %2207, %v2231_v1   ;;  %v5314_v16 = vld [vmem:[#allocation22_spill] sm:$0xff]  ;;  %v1020_v1 = vadd.s32 130, %v2391_v43 }
 0x1aa   :  { %v5271_v33 = vsel %vm3758_vm3, 4294967295, %v5270_v33  ;;  %vm3770_vm1 = vmor %vm5274_vm9, %vm904_vm13  ;;  %v1562_v49 = vsel %vm5277_vm14, %v2974_v48, %v1336_v45  ;;  %vm5278_vm13 = vcmp.eq.s32.totalorder %v2969_v59, %v1050_v31  ;;  %vm661_vm9 = vcmp.eq.s32.totalorder %v2969_v59, %v2895_v8  ;;  %v1101_v21 = vpop.permute.xlu1 %1100  ;;  %v5295_v31 = vld [vmem:[#allocation10_spill] sm:$0xff] }
 0x1ab   :  { %v5276_v53 = vsel %vm3770_vm1, 4294967295, %v5275_v53  ;;  %2015 = vmatprep.mubr.msk.f32.mxu0 %vm5272_vm10, %v1562_v49  ;;  %vm1205_vm8 = vmor %vm3651_vm7, %vm5278_vm13  ;;  %v1592_v48 = vsel %vm5279_vm12, %v1488_v26, %v1366_v62  ;;  %vm1174_vm10 = vcmp.eq.s32.totalorder %v2977_v5, %v2955_v25  ;;  %vm5280_vm1 = vcmask 113664  }
 0x1ac   :  { %vm726_vm14 = vmor %vm3668_vm15, %vm662_vm4  ;;  %2030 = vmatprep.mubr.msk.f32.mxu1 %vm5280_vm1, %v1592_v48  ;;  %v1335_v11 = vsel %vm1205_vm8, 1.0, %v2273_v52  ;;  %vm5281_vm7 = vnez %v5254_v28  ;;  %vm917_vm1 = vcmp.eq.s32.totalorder %v2969_v59, %v3547_v10  ;;  %vm920_vm8 = vcmp.eq.s32.totalorder %v2977_v5, %v3448_v4  ;;  %v5300_v28 = vld [vmem:[#allocation37_spill] sm:$0xff] }
 0x1ad   :  { %vm982_vm3 = vmor %vm726_vm14, %vm918_vm6  ;;  %1818 = vmatmul.mubr.f32.gmra.mrb[6].mxu0 %v1335_v11  ;;  %1893 = vmatmul.mubr.f32.gmra.mrb[4].mxu1 %v1365_v38  ;;  %vm907_vm6 = vcmp.eq.s32.totalorder %v2969_v59, %v827_v41  ;;  %v5287_v10 = vmov 0  ;;  %vm5289_vm12 = vcmp.eq.s32.totalorder %v2977_v5, 141  ;;  %v5318_v26 = vmov 0 }
 0x1ae   :  { %vm3805_vm13 = vmor %vm5281_vm7, %vm664_vm0  ;;  %vm908_vm0 = vcmp.eq.s32.totalorder %v2977_v5, %v827_v41  ;;  %vm1176_vm7 = vcmp.eq.s32.totalorder %v2977_v5, %v1101_v21  ;;  %2208 = vset.pattern.permute.xlu1 %v5047_v40  ;;  %v5320_v48 = vmov 0  ;;  %v780_v11 = vadd.s32 120, %v2511_v46 }
 0x1af   :  { %vm725_vm15 = vmor %vm3712_vm11, %vm661_vm9  ;;  %vm5286_vm11 = vnez %v5268_v34  ;;  %868 = vperm.xlu1 %2208, %v779_v36   ;;  %v2232_v34 = vld [vmem:[%s4923_s0 + $0x58] sm:$0xff]  ;;  %v5323_v8 = vmov 0  ;;  %v5331_v36 = vld [vmem:[#allocation73_spill] sm:$0xff] }
 0x1b0   :  { %vm1238_vm4 = vmor %vm982_vm3, %vm1174_vm10  ;;  %vm1173_vm3 = vcmp.eq.s32.totalorder %v2969_v59, %v2955_v25  ;;  %v1019_v25 = vadd.s32 130, %v2393_v44 }
 0x1b1   :  { %vm3827_vm5 = vmor %vm3731_vm2, %vm907_vm6  ;;  %vm215_vm6 = vcmp.eq.s32.totalorder %v2969_v59, %v5235_v23 }
 0x1b2   :  { %v5285_v17 = vsel %vm3827_vm5, 4294967295, %v5284_v17  ;;  %vm3833_vm9 = vmor %vm5286_vm11, %vm908_vm0  ;;  %vm919_vm0 = vcmp.eq.s32.totalorder %v2969_v59, %v3448_v4  ;;  %vm1175_vm5 = vcmp.eq.s32.totalorder %v2969_v59, %v1101_v21 }
 0x1b3   :  { %v5288_v10 = vsel %vm3833_vm9, 4294967295, %v5287_v10  ;;  %vm981_vm14 = vmor %vm725_vm15, %vm917_vm1  ;;  %vm407_vm15 = vcmp.eq.s32.totalorder %v2969_v59, %v5236_v18  ;;  %v1493_v18 = vpop.permute.xlu1 %1492  ;;  %2209 = vset.pattern.permute.xlu1 %v5046_v9 }
 0x1b4   :  { %vm984_vm2 = vmor %vm3805_vm13, %vm920_vm8  ;;  %vm663_vm13 = vcmp.eq.s32.totalorder %v2969_v59, %v2890_v13  ;;  %1076 = vperm.xlu1 %2209, %v1019_v25  }
 0x1b5   :  { %vm3847_vm10 = vmor %vm1238_vm4, %vm5289_vm12 }
 0x1b6   :  { %vm3857_vm1 = vmor %vm981_vm14, %vm1173_vm3  ;;  %v1368_v13 = vsel %vm3847_vm10, 1.0, %v2273_v52  ;;  %vm183_vm3 = vcmp.eq.s32.totalorder %v2969_v59, %v5295_v31  ;;  %vm375_vm14 = vcmp.eq.s32.totalorder %v2969_v59, %v5296_v58  ;;  %vm5298_vm10 = vcmask 113664  }
 0x1b7   :  { %vm1240_vm4 = vmor %vm984_vm2, %vm1176_vm7  ;;  %vm5297_vm7 = vcmp.eq.s32.totalorder %v2977_v5, 140  ;;  %v1367_v4 = vsel %vm3857_vm1, 1.0, %v2273_v52  ;;  %vm380_vm1 = vcmp.eq.s32.totalorder %v2977_v5, %v5300_v28  ;;  %v3924_v45 = vpop.permute.xlu1 %847 }
 0x1b8   :  { %vm5294_vm8 = vmmov %vm5289_vm12  ;;  %v1594_v44 = vsel %vm5297_vm7, %v1493_v18, %v1368_v13  ;;  %2210 = vset.pattern.permute.xlu1 %v5054_v22  ;;  %v2234_v18 = vld [vmem:[%s4923_s0 + $0x60] sm:$0xff] }
 0x1b9   :  { %vm1306_vm11 = vmor %vm1240_vm4, %vm5294_vm8  ;;  %2031 = vmatprep.mubr.msk.f32.mxu1 %vm5298_vm10, %v1594_v44  ;;  %vm379_vm8 = vcmp.eq.s32.totalorder %v2969_v59, %v5300_v28  ;;  %1452 = vperm.xlu1 %2210, %v2232_v34   ;;  %v5366_v34 = vld [vmem:[#allocation63_spill] sm:$0xff] }
 0x1ba   :  { %vm471_vm12 = vmor %vm215_vm6, %vm407_vm15  ;;  %v1370_v23 = vsel %vm1306_vm11, 1.0, %v2273_v52  ;;  %vm184_vm6 = vcmp.eq.s32.totalorder %v2977_v5, %v5295_v31  ;;  %vm376_vm15 = vcmp.eq.s32.totalorder %v2977_v5, %v5296_v58  ;;  %1898 = vmatmul.mubr.f32.gmra.mrb[6].mxu1 %v1367_v4  ;;  %v5351_v4 = vld [vmem:[#allocation48_spill] sm:$0xff] }
 0x1bb   :  { %vm727_vm2 = vmor %vm471_vm12, %vm663_vm13  ;;  %vm187_vm13 = vcmp.eq.s32.totalorder %v2969_v59, %v5299_v19  ;;  %vm188_vm12 = vcmp.eq.s32.totalorder %v2977_v5, %v5299_v19  ;;  %v3998_v62 = vpop.permute.xlu1 %1103 }
 0x1bc   :  { %vm983_vm4 = vmor %vm727_vm2, %vm919_vm0 }
 0x1bd   :  { %vm5301_vm11 = vmmov %vm5297_vm7  ;;  %vm632_vm7 = vcmp.eq.s32.totalorder %v2977_v5, %v2837_v2 }
 0x1be   :  { %v1596_v15 = vsel %vm5301_vm11, %v2988_v29, %v1370_v23  ;;  %vm1239_vm0 = vmor %vm983_vm4, %vm1175_vm5  ;;  %v5305_v29 = vld [vmem:[#allocation36_spill] sm:$0xff] }
 0x1bf   :  { %vm3907_vm2 = vmor %vm183_vm3, %vm375_vm14  ;;  %vm377_vm4 = vcmp.eq.s32.totalorder %v2969_v59, %v5305_v29  ;;  %vm888_vm3 = vcmp.eq.s32.totalorder %v2977_v5, %v2957_v32  ;;  %v1369_v37 = vsel %vm1239_vm0, 1.0, %v2273_v52  ;;  %v1418_v38 = vpop.permute.xlu1 %1417 }
 0x1c0   :  { %vm5304_vm5 = vmmov %vm5298_vm10 }
 0x1c1   :  { %2032 = vmatprep.mubr.msk.f32.mxu1 %vm5304_vm5, %v1596_v15  ;;  %vm440_vm10 = vmor %vm184_vm6, %vm376_vm15  ;;  %vm1144_vm6 = vcmp.eq.s32.totalorder %v2977_v5, %v3821_v7  ;;  %vm185_vm15 = vcmp.eq.s32.totalorder %v2969_v59, %v5308_v27  ;;  %vm410_vm5 = vcmp.eq.s32.totalorder %v2977_v5, %v5309_v54  ;;  %v2235_v15 = vld [vmem:[%s4923_s0 + $0xe0] sm:$0xff] }
 0x1c2   :  { %vm3934_vm11 = vmor %vm187_vm13, %vm379_vm8  ;;  %1903 = vmatmul.mubr.f32.gmra.mrb[8].mxu1 %v1369_v37  ;;  %vm186_vm8 = vcmp.eq.s32.totalorder %v2977_v5, %v5308_v27  ;;  %v781_v37 = vadd.s32 120, %v5359_v12  ;;  %v5400_v27 = vld [vmem:[#allocation64_spill] sm:$0xff] }
 0x1c3   :  { %vm696_vm14 = vmor %vm440_vm10, %vm632_vm7  ;;  %vm631_vm7 = vcmp.eq.s32.totalorder %v2969_v59, %v2837_v2  ;;  %v3987_v2 = vpop.permute.xlu0 %829 }
 0x1c4   :  { %vm3951_vm13 = vmor %vm188_vm12, %vm380_vm1  ;;  %vm218_vm1 = vcmp.eq.s32.totalorder %v2977_v5, %v5314_v16 }
 0x1c5   :  { %vm3961_vm0 = vmor %vm185_vm15, %vm377_vm4  ;;  %vm5315_vm4 = vcmp.eq.s32.totalorder %v2977_v5, %v5305_v29  ;;  %vm409_vm15 = vcmp.eq.s32.totalorder %v2969_v59, %v5309_v54  ;;  %v5357_v29 = vld [vmem:[#allocation47_spill] sm:$0xff]  ;;  %v5362_v54 = vld [vmem:[#allocation24_spill] sm:$0xff] }
 0x1c6   :  { %vm952_vm12 = vmor %vm696_vm14, %vm888_vm3 }
 0x1c7   :  { %vm3978_vm10 = vmor %vm186_vm8, %vm5315_vm4  ;;  %vm887_vm8 = vcmp.eq.s32.totalorder %v2969_v59, %v2957_v32  ;;  %vm217_vm4 = vcmp.eq.s32.totalorder %v2969_v59, %v5314_v16  ;;  %v2233_v32 = vld [vmem:[%s4923_s0 + $0xd8] sm:$0xff]  ;;  %v1056_v56 = vpop.permute.xlu0 %1055 }
 0x1c8   :  { %vm1208_vm3 = vmor %vm952_vm12, %vm1144_vm6  ;;  %vm1143_vm12 = vcmp.eq.s32.totalorder %v2969_v59, %v3821_v7  ;;  %1532 = vperm.xlu1 %2210, %v2233_v32   ;;  %v5372_v32 = vld [vmem:[#allocation65_spill] sm:$0xff] }
 0x1c9   :  { %vm3992_vm14 = vmor %vm218_vm1, %vm410_vm5  ;;  %vm635_vm5 = vcmp.eq.s32.totalorder %v2969_v59, %v2844_v14  ;;  %vm5322_vm1 = vcmp.eq.s32.totalorder %v2977_v5, 141 }
 0x1ca   :  { %v5319_v26 = vsel %vm3992_vm14, 4294967295, %v5318_v26  ;;  %vm695_vm6 = vmor %vm3907_vm2, %vm631_vm7  ;;  %vm636_vm2 = vcmp.eq.s32.totalorder %v2977_v5, %v2844_v14 }
 0x1cb   :  { %vm4006_vm9 = vmor %vm217_vm4, %vm409_vm15  ;;  %vm633_vm15 = vcmp.eq.s32.totalorder %v2969_v59, %v2848_v24 }
 0x1cc   :  { %v5321_v48 = vsel %vm4006_vm9, 4294967295, %v5320_v48  ;;  %vm1274_vm14 = vmor %vm1208_vm3, %vm5322_vm1  ;;  %vm634_vm3 = vcmp.eq.s32.totalorder %v2977_v5, %v2848_v24  ;;  %2211 = vset.pattern.permute.xlu1 %v5047_v40 }
 0x1cd   :  { %vm951_vm7 = vmor %vm695_vm6, %vm887_vm8  ;;  %v1338_v14 = vsel %vm1274_vm14, 1.0, %v2273_v52  ;;  %vm666_vm6 = vcmp.eq.s32.totalorder %v2977_v5, %v2900_v55  ;;  %871 = vperm.xlu1 %2211, %v780_v11   ;;  %vm5330_vm14 = vcmask 113664   ;;  %v1107_v11 = vpop.permute.xlu0 %1106 }
 0x1ce   :  { %vm1207_vm4 = vmor %vm951_vm7, %vm1143_vm12  ;;  %vm5332_vm7 = vnez %v5319_v26 }
 0x1cf   :  { %vm4024_vm9 = vmor %vm3934_vm11, %vm635_vm5  ;;  %vm5327_vm11 = vcmp.eq.s32.totalorder %v2977_v5, 140  ;;  %v1337_v7 = vsel %vm1207_vm4, 1.0, %v2273_v52  ;;  %vm665_vm5 = vcmp.eq.s32.totalorder %v2969_v59, %v2900_v55  ;;  %vm889_vm4 = vcmp.eq.s32.totalorder %v2969_v59, %v3209_v35  ;;  %v4068_v55 = vpop.permute.xlu1 %850 }
 0x1d0   :  { %v5324_v8 = vsel %vm4024_vm9, 4294967295, %v5323_v8  ;;  %vm4033_vm8 = vmor %vm3951_vm13, %vm636_vm2  ;;  %v1564_v41 = vsel %vm5327_vm11, %v1418_v38, %v1338_v14  ;;  %vm890_vm13 = vcmp.eq.s32.totalorder %v2977_v5, %v3209_v35  ;;  %vm1146_vm2 = vcmp.eq.s32.totalorder %v2977_v5, %v1056_v56  ;;  %v5382_v35 = vld [vmem:[#allocation7_spill] sm:$0xff] }
 0x1d1   :  { %vm4044_vm12 = vmor %vm3961_vm0, %vm633_vm15  ;;  %2016 = vmatprep.mubr.msk.f32.mxu0 %vm5330_vm14, %v1564_v41  ;;  %vm892_vm0 = vcmp.eq.s32.totalorder %v2977_v5, %v5331_v36  ;;  %vm5335_vm14 = vnez %v5321_v48  ;;  %2212 = vset.pattern.permute.xlu1 %v5046_v9  ;;  %v2236_v41 = vld [vmem:[%s4923_s0 + $0x68] sm:$0xff]  ;;  %v782_v6 = vadd.s32 120, %v5382_v35 }
 0x1d2   :  { %vm698_vm1 = vmor %vm3978_vm10, %vm634_vm3  ;;  %1823 = vmatmul.mubr.f32.gmra.mrb[8].mxu0 %v1337_v7  ;;  %vm891_vm10 = vcmp.eq.s32.totalorder %v2969_v59, %v5331_v36  ;;  %1079 = vperm.xlu1 %2212, %v1020_v1  }
 0x1d3   :  { %vm4062_vm15 = vmor %vm5332_vm7, %vm666_vm6  ;;  %vm922_vm6 = vcmp.eq.s32.totalorder %v2977_v5, %v3924_v45  ;;  %v1059_v25 = vpop.permute.xlu1 %1058 }
 0x1d4   :  { %vm954_vm11 = vmor %vm698_vm1, %vm890_vm13 }
 0x1d5   :  { %vm1210_vm3 = vmor %vm954_vm11, %vm1146_vm2  ;;  %vm5340_vm2 = vcmp.eq.s32.totalorder %v2977_v5, 141  ;;  %vm5343_vm11 = vnez %v5324_v8  ;;  %v5373_v8 = vld [vmem:[#allocation6_spill] sm:$0xff] }
 0x1d6   :  { %vm4074_vm9 = vmor %vm5335_vm14, %vm665_vm5  ;;  %vm1178_vm5 = vcmp.eq.s32.totalorder %v2977_v5, %v3998_v62  ;;  %2213 = vset.pattern.permute.xlu1 %v5054_v22 }
 0x1d7   :  { %vm956_vm13 = vmor %vm4033_vm8, %vm892_vm0  ;;  %1457 = vperm.xlu1 %2213, %v2234_v18   ;;  %v1423_v58 = vpop.permute.xlu1 %1422  ;;  %v5386_v18 = vld [vmem:[#allocation5_spill] sm:$0xff] }
 0x1d8   :  { %vm4085_vm1 = vmor %vm4044_vm12, %vm889_vm4  ;;  %vm1145_vm12 = vcmp.eq.s32.totalorder %v2969_v59, %v1056_v56  ;;  %vm1148_vm4 = vcmp.eq.s32.totalorder %v2977_v5, %v1059_v25  ;;  %v1021_v56 = vadd.s32 130, %v5373_v8  ;;  %v1022_v13 = vadd.s32 130, %v5386_v18  ;;  %v5426_v18 = vld [vmem:[#allocation66_spill] sm:$0xff] }
 0x1d9   :  { %vm4093_vm7 = vmor %vm1210_vm3, %vm5340_vm2 }
 0x1da   :  { %vm4099_vm14 = vmor %vm5343_vm11, %vm891_vm10  ;;  %vm921_vm10 = vcmp.eq.s32.totalorder %v2969_v59, %v3924_v45  ;;  %v1340_v44 = vsel %vm4093_vm7, 1.0, %v2273_v52  ;;  %vm219_vm7 = vcmp.eq.s32.totalorder %v2969_v59, %v5356_v39 }
 0x1db   :  { %vm986_vm8 = vmor %vm4062_vm15, %vm922_vm6  ;;  %1537 = vperm.xlu1 %2213, %v2235_v15   ;;  %v1503_v16 = vpop.permute.xlu1 %1502  ;;  %v1065_v15 = vpop.permute.xlu0 %1064 }
 0x1dc   :  { %vm4106_vm0 = vmor %vm986_vm8, %vm1178_vm5  ;;  %vm1177_vm5 = vcmp.eq.s32.totalorder %v2969_v59, %v3998_v62  ;;  %vm414_vm8 = vcmp.eq.s32.totalorder %v2977_v5, %v5351_v4 }
 0x1dd   :  { %vm1212_vm3 = vmor %vm956_vm13, %vm1148_vm4  ;;  %vm1147_vm13 = vcmp.eq.s32.totalorder %v2969_v59, %v1059_v25  ;;  %vm411_vm4 = vcmp.eq.s32.totalorder %v2969_v59, %v5357_v29  ;;  %v5385_v25 = vld [vmem:[#allocation11_spill] sm:$0xff] }
 0x1de   :  { %vm5348_vm15 = vmmov %vm5340_vm2 }
 0x1df   :  { %vm1278_vm6 = vmor %vm1212_vm3, %vm5348_vm15  ;;  %vm222_vm3 = vcmp.eq.s32.totalorder %v2977_v5, %v5362_v54  ;;  %2214 = vset.pattern.permute.xlu1 %v5047_v40  ;;  %v4224_v38 = vpop.permute.xlu1 %1061 }
 0x1e0   :  { %vm1209_vm2 = vmor %vm4085_vm1, %vm1145_vm12  ;;  %v1342_v31 = vsel %vm1278_vm6, 1.0, %v2273_v52  ;;  %vm5355_vm12 = vcmp.eq.s32.totalorder %v2977_v5, 140  ;;  %vm412_vm6 = vcmp.eq.s32.totalorder %v2977_v5, %v5357_v29  ;;  %874 = vperm.xlu1 %2214, %v781_v37  }
 0x1e1   :  { %vm4125_vm11 = vmor %vm4074_vm9, %vm921_vm10  ;;  %v1566_v28 = vsel %vm5355_vm12, %v1423_v58, %v1340_v44  ;;  %vm5358_vm10 = vcmask 113664   ;;  %v1339_v45 = vsel %vm1209_vm2, 1.0, %v2273_v52  ;;  %v5389_v58 = vld [vmem:[#allocation39_spill] sm:$0xff] }
 0x1e2   :  { %vm5352_vm1 = vmmov %vm5348_vm15  ;;  %2017 = vmatprep.mubr.msk.f32.mxu0 %vm5358_vm10, %v1566_v28  ;;  %vm220_vm15 = vcmp.eq.s32.totalorder %v2977_v5, %v5356_v39  ;;  %v5390_v44 = vld [vmem:[#allocation27_spill] sm:$0xff]  ;;  %v5393_v28 = vld [vmem:[#allocation57_spill] sm:$0xff] }
 0x1e3   :  { %vm4140_vm9 = vmor %vm4106_vm0, %vm5352_vm1  ;;  %1828 = vmatmul.mubr.f32.gmra.mrb[10].mxu0 %v1339_v45  ;;  %vm668_vm1 = vcmp.eq.s32.totalorder %v2977_v5, %v5366_v34  ;;  %v1110_v14 = vpop.permute.xlu1 %1109  ;;  %v2238_v39 = vld [vmem:[%s4923_s0 + $0x70] sm:$0xff] }
 0x1e4   :  { %vm4161_vm0 = vmor %vm4125_vm11, %vm1177_vm5  ;;  %2215 = vset.pattern.permute.xlu1 %v5046_v9 }
 0x1e5   :  { %vm5363_vm2 = vmmov %vm5355_vm12  ;;  %v1371_v48 = vsel %vm4161_vm0, 1.0, %v2273_v52  ;;  %vm926_vm0 = vcmp.eq.s32.totalorder %v2977_v5, %v3523_v0  ;;  %1082 = vperm.xlu1 %2215, %v1021_v56   ;;  %v5409_v56 = vld [vmem:[#allocation26_spill] sm:$0xff] }
 0x1e6   :  { %v1568_v50 = vsel %vm5363_vm2, %v3022_v63, %v1342_v31  ;;  %vm1211_vm5 = vmor %vm4099_vm14, %vm1147_vm13  ;;  %v1372_v63 = vsel %vm4140_vm9, 1.0, %v2273_v52  ;;  %vm924_vm13 = vcmp.eq.s32.totalorder %v2977_v5, %v4068_v55  ;;  %v5388_v31 = vld [vmem:[#allocation14_spill] sm:$0xff] }
 0x1e7   :  { %vm4181_vm11 = vmor %vm222_vm3, %vm414_vm8  ;;  %v1341_v62 = vsel %vm1211_vm5, 1.0, %v2273_v52  ;;  %v1508_v7 = vpop.permute.xlu1 %1507 }
 0x1e8   :  { %vm5367_vm12 = vmmov %vm5358_vm10  ;;  %vm667_vm10 = vcmp.eq.s32.totalorder %v2969_v59, %v5366_v34 }
 0x1e9   :  { %2018 = vmatprep.mubr.msk.f32.mxu0 %vm5367_vm12, %v1568_v50  ;;  %vm4197_vm14 = vmor %vm219_vm7, %vm411_vm4  ;;  %vm670_vm4 = vcmp.eq.s32.totalorder %v2977_v5, %v5372_v32  ;;  %2216 = vset.pattern.permute.xlu1 %v5054_v22  ;;  %v2240_v50 = vld [vmem:[%s4923_s0 + $0xf8] sm:$0xff] }
 0x1ea   :  { %vm5370_vm8 = vmmov %vm5363_vm2  ;;  %1833 = vmatmul.mubr.f32.gmra.mrb[12].mxu0 %v1341_v62  ;;  %1462 = vperm.xlu1 %2216, %v2236_v41   ;;  %v5405_v62 = vld [vmem:[#allocation13_spill] sm:$0xff]  ;;  %v5412_v41 = vld [vmem:[#allocation67_spill] sm:$0xff] }
 0x1eb   :  { %v1598_v26 = vsel %vm5370_vm8, %v1503_v16, %v1372_v63  ;;  %vm476_vm9 = vmor %vm220_vm15, %vm412_vm6  ;;  %vm1180_vm15 = vcmp.eq.s32.totalorder %v2977_v5, %v1107_v11  ;;  %v4280_v23 = vpop.permute.xlu1 %856  ;;  %v5402_v63 = vld [vmem:[#allocation40_spill] sm:$0xff] }
 0x1ec   :  { %vm5371_vm3 = vmmov %vm5367_vm12 }
 0x1ed   :  { %2033 = vmatprep.mubr.msk.f32.mxu1 %vm5371_vm3, %v1598_v26  ;;  %vm732_vm7 = vmor %vm476_vm9, %vm668_vm1  ;;  %vm923_vm1 = vcmp.eq.s32.totalorder %v2969_v59, %v4068_v55  ;;  %vm5374_vm9 = vcmp.eq.s32.totalorder %v2977_v5, 141  ;;  %vm413_vm3 = vcmp.eq.s32.totalorder %v2969_v59, %v5351_v4  ;;  %v5380_v55 = vld [vmem:[#allocation38_spill] sm:$0xff]  ;;  %v5391_v4 = vld [vmem:[#allocation49_spill] sm:$0xff] }
 0x1ee   :  { %1908 = vmatmul.mubr.f32.gmra.mrb[10].mxu1 %v1371_v48  ;;  %vm988_vm6 = vmor %vm732_vm7, %vm924_vm13  ;;  %v5406_v48 = vld [vmem:[#allocation50_spill] sm:$0xff] }
 0x1ef   :  { %vm731_vm2 = vmor %vm4197_vm14, %vm667_vm10  ;;  %vm1179_vm14 = vcmp.eq.s32.totalorder %v2969_v59, %v1107_v11 }
 0x1f0   :  { %vm734_vm5 = vmor %vm4181_vm11, %vm670_vm4  ;;  %vm1182_vm11 = vcmp.eq.s32.totalorder %v2977_v5, %v1110_v14  ;;  %vm669_vm4 = vcmp.eq.s32.totalorder %v2969_v59, %v5372_v32  ;;  %v5453_v32 = vld [vmem:[#allocation31_spill] sm:$0xff] }
 0x1f1   :  { %vm1244_vm12 = vmor %vm988_vm6, %vm1180_vm15 }
 0x1f2   :  { %vm990_vm8 = vmor %vm734_vm5, %vm926_vm0  ;;  %vm925_vm0 = vcmp.eq.s32.totalorder %v2969_v59, %v3523_v0  ;;  %v2237_v0 = vld [vmem:[%s4923_s0 + $0xe8] sm:$0xff] }
 0x1f3   :  { %vm987_vm13 = vmor %vm731_vm2, %vm923_vm1  ;;  %vm221_vm2 = vcmp.eq.s32.totalorder %v2969_v59, %v5362_v54  ;;  %1542 = vperm.xlu1 %2216, %v2237_v0   ;;  %v2239_v54 = vld [vmem:[%s4923_s0 + $0xf0] sm:$0xff]  ;;  %s2274_s0 = smov [#allocation2]  }
 0x1f4   :  { %vm4234_vm10 = vmor %vm1244_vm12, %vm5374_vm9  ;;  %vm1181_vm12 = vcmp.eq.s32.totalorder %v2969_v59, %v1110_v14  ;;  %s2000_s5 = sshll.u32 %s2274_s0, 4  ;;  %s2001_s5 = int_to_ptr.vmem [resolvable:$true] %s2000_s5 }
 0x1f5   :  { %vm1246_vm7 = vmor %vm990_vm8, %vm1182_vm11  ;;  %v1374_v1 = vsel %vm4234_vm10, 1.0, %v2273_v52  ;;  %s2241_s6 = scalar_lea.vmem %s2001_s5, 4096  ;;  %p2246_p1 = scmp.lt.s32.totalorder %s2001_s5, %s2001_s5 }
 0x1f6   :  { %vm5377_vm15 = vmmov %vm5374_vm9  ;;  %vm5378_vm9 = vcmp.eq.s32.totalorder %v2977_v5, 140  ;;  %p2242_p0 = scmp.ne.s32.totalorder %s2001_s5, %s2241_s6  ;;  %p2247_p2 = scmp.lt.s32.totalorder %s2241_s6, %s2241_s6 }
 0x1f7   :  { %vm1312_vm6 = vmor %vm1246_vm7, %vm5377_vm15  ;;  %v1600_v36 = vsel %vm5378_vm9, %v1508_v7, %v1374_v1  ;;  %vm638_vm7 = vcmp.eq.s32.totalorder %v2977_v5, %v5383_v51  ;;  %vm190_vm15 = vcmp.eq.s32.totalorder %v2977_v5, %v5385_v25  ;;  %2218 = vset.pattern.permute.xlu1 %v5047_v40  ;;  %v4295_v40 = vpop.permute.xlu1 %1112  ;;  %v5415_v1 = vmov 0 }
 0x1f8   :  { %vm1243_vm5 = vmor %vm987_vm13, %vm1179_vm14  ;;  %v1376_v24 = vsel %vm1312_vm6, 1.0, %v2273_v52  ;;  %vm5379_vm13 = vcmask 113664   ;;  %vm382_vm14 = vcmp.eq.s32.totalorder %v2977_v5, %v5380_v55  ;;  %vm894_vm6 = vcmp.eq.s32.totalorder %v2977_v5, %v3296_v57  ;;  %877 = vperm.xlu1 %2218, %v782_v6   ;;  %p2248_p3 = por %p2247_p2, %p2246_p1 }
 0x1f9   :  { %vm477_vm1 = vmor %vm221_vm2, %vm413_vm3  ;;  %2034 = vmatprep.mubr.msk.f32.mxu1 %vm5379_vm13, %v1600_v36  ;;  %v1373_v21 = vsel %vm1243_vm5, 1.0, %v2273_v52  ;;  %vm381_vm5 = vcmp.eq.s32.totalorder %v2969_v59, %v5380_v55  ;;  %v1116_v36 = vpop.permute.xlu0 %1115 }
 0x1fa   :  { %vm733_vm8 = vmor %vm477_vm1, %vm669_vm4  ;;  %1913 = vmatmul.mubr.f32.gmra.mrb[12].mxu1 %v1373_v21  ;;  %p2249_p4 = pnand %p2248_p3, %p2242_p0 }
 0x1fb   :  { %vm989_vm11 = vmor %vm733_vm8, %vm925_vm0  ;;  %vm1150_vm0 = vcmp.eq.s32.totalorder %v2977_v5, %v4224_v38 }
 0x1fc   :  { %vm5381_vm10 = vmmov %vm5378_vm9  ;;  %vm189_vm9 = vcmp.eq.s32.totalorder %v2969_v59, %v5385_v25  ;;  %2219 = vset.pattern.permute.xlu1 %v5046_v9 }
 0x1fd   :  { %v1602_v43 = vsel %vm5381_vm10, %v3052_v3, %v1376_v24  ;;  %vm1245_vm3 = vmor %vm989_vm11, %vm1181_vm12  ;;  %vm637_vm12 = vcmp.eq.s32.totalorder %v2969_v59, %v5383_v51  ;;  %1085 = vperm.xlu1 %2219, %v1022_v13  }
 0x1fe   :  { %vm5384_vm4 = vmmov %vm5379_vm13  ;;  %v1375_v3 = vsel %vm1245_vm3, 1.0, %v2273_v52  ;;  %vm1149_vm3 = vcmp.eq.s32.totalorder %v2969_v59, %v4224_v38  ;;  %v5410_v38 = vld [vmem:[#allocation59_spill] sm:$0xff] }
 0x1ff   :  { %2035 = vmatprep.mubr.msk.f32.mxu1 %vm5384_vm4, %v1602_v43  ;;  %vm446_vm2 = vmor %vm190_vm15, %vm382_vm14  ;;  %vm893_vm14 = vcmp.eq.s32.totalorder %v2969_v59, %v3296_v57  ;;  %v1433_v57 = vpop.permute.xlu1 %1432 }
 0x200   :  { %vm702_vm1 = vmor %vm446_vm2, %vm638_vm7  ;;  %1918 = vmatmul.mubr.f32.gmra.mrb[14].mxu1 %v1375_v3  ;;  %vm5387_vm7 = vcmp.eq.s32.totalorder %v2977_v5, 141  ;;  %vm383_vm2 = vcmp.eq.s32.totalorder %v2969_v59, %v5389_v58  ;;  %v5425_v3 = vld [vmem:[#allocation51_spill] sm:$0xff] }
 0x201   :  { %vm958_vm8 = vmor %vm702_vm1, %vm894_vm6  ;;  %vm191_vm6 = vcmp.eq.s32.totalorder %v2969_v59, %v5388_v31  ;;  %vm384_vm1 = vcmp.eq.s32.totalorder %v2977_v5, %v5389_v58  ;;  %2220 = vset.pattern.permute.xlu1 %v5054_v22  ;;  %v5395_v22 = vld [vmem:[#allocation74_spill] sm:$0xff] }
 0x202   :  { %vm1214_vm11 = vmor %vm958_vm8, %vm1150_vm0  ;;  %vm416_vm8 = vcmp.eq.s32.totalorder %v2977_v5, %v5391_v4  ;;  %1467 = vperm.xlu1 %2220, %v2238_v39   ;;  %v5438_v39 = vld [vmem:[#allocation28_spill] sm:$0xff] }
 0x203   :  { %vm445_vm13 = vmor %vm189_vm9, %vm381_vm5  ;;  %vm192_vm5 = vcmp.eq.s32.totalorder %v2977_v5, %v5388_v31  ;;  %vm5392_vm9 = vcmp.eq.s32.totalorder %v2977_v5, 140  ;;  %v4350_v12 = vpop.permute.xlu1 %859 }
 0x204   :  { %vm701_vm10 = vmor %vm445_vm13, %vm637_vm12  ;;  %vm224_vm12 = vcmp.eq.s32.totalorder %v2977_v5, %v5390_v44  ;;  %vm639_vm13 = vcmp.eq.s32.totalorder %v2969_v59, %v5393_v28 }
 0x205   :  { %vm1280_vm4 = vmor %vm1214_vm11, %vm5387_vm7 }
 0x206   :  { %vm957_vm15 = vmor %vm701_vm10, %vm893_vm14  ;;  %v1344_v9 = vsel %vm1280_vm4, 1.0, %v2273_v52  ;;  %vm5394_vm14 = vcmask 113664   ;;  %vm223_vm10 = vcmp.eq.s32.totalorder %v2969_v59, %v5390_v44  ;;  %vm640_vm4 = vcmp.eq.s32.totalorder %v2977_v5, %v5393_v28  ;;  %1547 = vperm.xlu1 %2220, %v2239_v54   ;;  %v5434_v44 = vld [vmem:[#allocation15_spill] sm:$0xff] }
 0x207   :  { %vm1213_vm0 = vmor %vm957_vm15, %vm1149_vm3  ;;  %v1570_v19 = vsel %vm5392_vm9, %v1433_v57, %v1344_v9  ;;  %vm415_vm3 = vcmp.eq.s32.totalorder %v2969_v59, %v5391_v4  ;;  %vm672_vm9 = vcmp.eq.s32.totalorder %v2977_v5, %v5400_v27  ;;  %v1068_v42 = vpop.permute.xlu1 %1067  ;;  %v5430_v57 = vld [vmem:[#allocation41_spill] sm:$0xff]  ;;  %v5435_v4 = vld [vmem:[#allocation52_spill] sm:$0xff]  ;;  %v5444_v54 = vmov 0 }
 0x208   :  { %vm447_vm11 = vmor %vm191_vm6, %vm383_vm2  ;;  %2019 = vmatprep.mubr.msk.f32.mxu0 %vm5394_vm14, %v1570_v19  ;;  %v1343_v29 = vsel %vm1213_vm0, 1.0, %v2273_v52  ;;  %vm896_vm6 = vcmp.eq.s32.totalorder %v2977_v5, %v5395_v22  ;;  %vm1152_vm0 = vcmp.eq.s32.totalorder %v2977_v5, %v1065_v15  ;;  %vm928_vm14 = vcmp.eq.s32.totalorder %v2977_v5, %v4280_v23  ;;  %v5485_v19 = vld [vmem:[#allocation55_spill] sm:$0xff] }
 0x209   :  { %vm448_vm7 = vmor %vm192_vm5, %vm384_vm1  ;;  %1838 = vmatmul.mubr.f32.gmra.mrb[14].mxu0 %v1343_v29  ;;  %v5439_v29 = vld [vmem:[#allocation60_spill] sm:$0xff] }
 0x20a   :  { %vm480_vm15 = vmor %vm224_vm12, %vm416_vm8  ;;  %vm895_vm12 = vcmp.eq.s32.totalorder %v2969_v59, %v5395_v22  ;;  %1552 = vperm.xlu1 %2220, %v2240_v50  }
 0x20b   :  { %vm4345_vm2 = vmor %vm447_vm11, %vm639_vm13  ;;  %v1438_v34 = vpop.permute.xlu1 %1437 }
 0x20c   :  { %vm704_vm5 = vmor %vm448_vm7, %vm640_vm4  ;;  %vm1151_vm7 = vcmp.eq.s32.totalorder %v2969_v59, %v1065_v15  ;;  %vm5401_vm4 = vcmp.eq.s32.totalorder %v2977_v5, 141 }
 0x20d   :  { %vm4352_vm1 = vmor %vm223_vm10, %vm415_vm3  ;;  %vm1184_vm10 = vcmp.eq.s32.totalorder %v2977_v5, %v4295_v40 }
 0x20e   :  { %vm960_vm8 = vmor %vm704_vm5, %vm896_vm6  ;;  %vm671_vm6 = vcmp.eq.s32.totalorder %v2969_v59, %v5400_v27 }
 0x20f   :  { %vm1216_vm11 = vmor %vm960_vm8, %vm1152_vm0  ;;  %v1518_v11 = vpop.permute.xlu1 %1517 }
 0x210   :  { %vm736_vm13 = vmor %vm480_vm15, %vm672_vm9  ;;  %vm927_vm9 = vcmp.eq.s32.totalorder %v2969_v59, %v4280_v23  ;;  %v5424_v23 = vld [vmem:[#allocation29_spill] sm:$0xff] }
 0x211   :  { %vm959_vm3 = vmor %vm4345_vm2, %vm895_vm12  ;;  %vm1183_vm12 = vcmp.eq.s32.totalorder %v2969_v59, %v4295_v40  ;;  %v1119_v40 = vpop.permute.xlu0 %1118 }
 0x212   :  { %vm1282_vm15 = vmor %vm1216_vm11, %vm5401_vm4  ;;  %vm385_vm11 = vcmp.eq.s32.totalorder %v2969_v59, %v5402_v63 }
 0x213   :  { %vm992_vm0 = vmor %vm736_vm13, %vm928_vm14  ;;  %v1346_v16 = vsel %vm1282_vm15, 1.0, %v2273_v52  ;;  %vm5403_vm14 = vcmp.eq.s32.totalorder %v2977_v5, 140  ;;  %vm417_vm15 = vcmp.eq.s32.totalorder %v2969_v59, %v5406_v48  ;;  %v863_v7 = vpop.permute.xlu1 %862 }
 0x214   :  { %vm1248_vm5 = vmor %vm992_vm0, %vm1184_vm10  ;;  %v1572_v49 = vsel %vm5403_vm14, %v1438_v34, %v1346_v16  ;;  %vm386_vm10 = vcmp.eq.s32.totalorder %v2977_v5, %v5402_v63  ;;  %vm194_vm0 = vcmp.eq.s32.totalorder %v2977_v5, %v5405_v62 }
 0x215   :  { %vm1215_vm8 = vmor %vm959_vm3, %vm1151_vm7  ;;  %vm193_vm7 = vcmp.eq.s32.totalorder %v2969_v59, %v5405_v62  ;;  %v1122_v50 = vpop.permute.xlu0 %1121 }
 0x216   :  { %vm735_vm2 = vmor %vm4352_vm1, %vm671_vm6  ;;  %vm5404_vm1 = vcmask 113664   ;;  %v1345_v26 = vsel %vm1215_vm8, 1.0, %v2273_v52  ;;  %vm225_vm8 = vcmp.eq.s32.totalorder %v2969_v59, %v5409_v56 }
 0x217   :  { %vm1314_vm13 = vmor %vm1248_vm5, %vm5401_vm4  ;;  %2020 = vmatprep.mubr.msk.f32.mxu0 %vm5404_vm1, %v1572_v49  ;;  %v1071_v0 = vpop.permute.xlu1 %1070 }
 0x218   :  { %vm991_vm3 = vmor %vm735_vm2, %vm927_vm9  ;;  %1843 = vmatmul.mubr.f32.gmra.mrb[16].mxu0 %v1345_v26  ;;  %vm418_vm9 = vcmp.eq.s32.totalorder %v2977_v5, %v5406_v48  ;;  %v1378_v8 = vsel %vm1314_vm13, 1.0, %v2273_v52 }
 0x219   :  { %vm1247_vm6 = vmor %vm991_vm3, %vm1183_vm12  ;;  %vm641_vm12 = vcmp.eq.s32.totalorder %v2969_v59, %v5410_v38  ;;  %vm642_vm3 = vcmp.eq.s32.totalorder %v2977_v5, %v5410_v38  ;;  %v1125_v38 = vpop.permute.xlu0 %1124 }
 0x21a   :  { %vm4400_vm5 = vmor %vm193_vm7, %vm385_vm11  ;;  %vm226_vm11 = vcmp.eq.s32.totalorder %v2977_v5, %v5409_v56  ;;  %v1377_v46 = vsel %vm1247_vm6, 1.0, %v2273_v52  ;;  %vm674_vm7 = vcmp.eq.s32.totalorder %v2977_v5, %v5412_v41 }
 0x21b   :  { %vm450_vm2 = vmor %vm194_vm0, %vm386_vm10  ;;  %vm673_vm10 = vcmp.eq.s32.totalorder %v2969_v59, %v5412_v41  ;;  %v5459_v41 = vld [vmem:[#allocation42_spill] sm:$0xff] }
 0x21c   :  { %vm5411_vm4 = vmmov %vm5403_vm14 }
 0x21d   :  { %v1604_v14 = vsel %vm5411_vm4, %v1518_v11, %v1378_v8  ;;  %vm481_vm14 = vmor %vm225_vm8, %vm417_vm15  ;;  %vm898_vm8 = vcmp.eq.s32.totalorder %v2977_v5, %v3378_v20  ;;  %v5454_v11 = vld [vmem:[#allocation53_spill] sm:$0xff]  ;;  %v5455_v8 = vld [vmem:[#allocation68_spill] sm:$0xff] }
 0x21e   :  { %2036 = vmatprep.mubr.msk.f32.mxu1 %vm5404_vm1, %v1604_v14  ;;  %vm482_vm13 = vmor %vm226_vm11, %vm418_vm9  ;;  %vm1154_vm9 = vcmp.eq.s32.totalorder %v2977_v5, %v1068_v42  ;;  %vm930_vm11 = vcmp.eq.s32.totalorder %v2977_v5, %v4350_v12  ;;  %vm1186_vm1 = vcmp.eq.s32.totalorder %v2977_v5, %v1116_v36 }
 0x21f   :  { %1923 = vmatmul.mubr.f32.gmra.mrb[16].mxu1 %v1377_v46  ;;  %vm4425_vm0 = vmor %vm4400_vm5, %vm641_vm12  ;;  %vm897_vm5 = vcmp.eq.s32.totalorder %v2969_v59, %v3378_v20  ;;  %v1443_v20 = vpop.permute.xlu1 %1442 }
 0x220   :  { %vm706_vm15 = vmor %vm450_vm2, %vm642_vm3 }
 0x221   :  { %vm4431_vm6 = vmor %vm481_vm14, %vm673_vm10  ;;  %vm1153_vm10 = vcmp.eq.s32.totalorder %v2969_v59, %v1068_v42 }
 0x222   :  { %v5416_v1 = vsel %vm4431_vm6, 4294967295, %v5415_v1  ;;  %vm738_vm4 = vmor %vm482_vm13, %vm674_vm7  ;;  %vm929_vm13 = vcmp.eq.s32.totalorder %v2969_v59, %v4350_v12  ;;  %vm5417_vm7 = vcmp.eq.s32.totalorder %v2977_v5, 141  ;;  %v5441_v12 = vld [vmem:[#allocation69_spill] sm:$0xff] }
 0x223   :  { %vm962_vm12 = vmor %vm706_vm15, %vm898_vm8  ;;  %v1523_v35 = vpop.permute.xlu1 %1522 }
 0x224   :  { %vm1218_vm2 = vmor %vm962_vm12, %vm1154_vm9  ;;  %vm5418_vm9 = vnez %v5416_v1  ;;  %v5464_v1 = vld [vmem:[#allocation54_spill] sm:$0xff] }
 0x225   :  { %vm994_vm3 = vmor %vm738_vm4, %vm930_vm11  ;;  %vm1185_vm4 = vcmp.eq.s32.totalorder %v2969_v59, %v1116_v36 }
 0x226   :  { %vm961_vm14 = vmor %vm4425_vm0, %vm897_vm5  ;;  %vm5420_vm5 = vcmp.eq.s32.totalorder %v2977_v5, 140 }
 0x227   :  { %vm1284_vm6 = vmor %vm1218_vm2, %vm5417_vm7  ;;  %vm5421_vm2 = vcmask 113664   ;;  %v4473_v13 = vpop.permute.xlu1 %865 }
 0x228   :  { %vm1250_vm8 = vmor %vm994_vm3, %vm1186_vm1  ;;  %v1348_v21 = vsel %vm1284_vm6, 1.0, %v2273_v52  ;;  %vm227_vm6 = vcmp.eq.s32.totalorder %v2969_v59, %v5424_v23 }
 0x229   :  { %vm1217_vm15 = vmor %vm961_vm14, %vm1153_vm10  ;;  %v1574_v55 = vsel %vm5420_vm5, %v1443_v20, %v1348_v21  ;;  %vm419_vm10 = vcmp.eq.s32.totalorder %v2969_v59, %v5425_v3  ;;  %v5467_v21 = vld [vmem:[#allocation30_spill] sm:$0xff] }
 0x22a   :  { %vm993_vm12 = vmor %vm5418_vm9, %vm929_vm13  ;;  %2021 = vmatprep.mubr.msk.f32.mxu0 %vm5421_vm2, %v1574_v55  ;;  %v1347_v43 = vsel %vm1217_vm15, 1.0, %v2273_v52  ;;  %vm228_vm13 = vcmp.eq.s32.totalorder %v2977_v5, %v5424_v23  ;;  %vm1156_vm9 = vcmp.eq.s32.totalorder %v2977_v5, %v1071_v0  ;;  %v5468_v55 = vld [vmem:[#allocation61_spill] sm:$0xff]  ;;  %v5473_v23 = vmov 0 }
 0x22b   :  { %vm5419_vm0 = vmmov %vm5417_vm7  ;;  %1848 = vmatmul.mubr.f32.gmra.mrb[18].mxu0 %v1347_v43  ;;  %vm420_vm7 = vcmp.eq.s32.totalorder %v2977_v5, %v5425_v3  ;;  %v1074_v31 = vpop.permute.xlu1 %1073  ;;  %v1128_v3 = vpop.permute.xlu0 %1127 }
 0x22c   :  { %vm1316_vm11 = vmor %vm1250_vm8, %vm5419_vm0  ;;  %vm676_vm8 = vcmp.eq.s32.totalorder %v2977_v5, %v5426_v18  ;;  %vm675_vm0 = vcmp.eq.s32.totalorder %v2969_v59, %v5426_v18 }
 0x22d   :  { %vm1249_vm3 = vmor %vm993_vm12, %vm1185_vm4  ;;  %v1380_v6 = vsel %vm1316_vm11, 1.0, %v2273_v52  ;;  %vm932_vm4 = vcmp.eq.s32.totalorder %v2977_v5, %v863_v7 }
 0x22e   :  { %vm5422_vm1 = vmmov %vm5420_vm5  ;;  %v1379_v25 = vsel %vm1249_vm3, 1.0, %v2273_v52  ;;  %vm5427_vm5 = vnez %v5250_v47 }
 0x22f   :  { %v1606_v51 = vsel %vm5422_vm1, %v1523_v35, %v1380_v6  ;;  %vm5423_vm14 = vmmov %vm5421_vm2  ;;  %vm1188_vm1 = vcmp.eq.s32.totalorder %v2977_v5, %v1119_v40  ;;  %v1448_v47 = vpop.permute.xlu1 %1447  ;;  %v5470_v6 = vld [vmem:[#allocation71_spill] sm:$0xff] }
 0x230   :  { %2037 = vmatprep.mubr.msk.f32.mxu1 %vm5423_vm14, %v1606_v51  ;;  %vm483_vm15 = vmor %vm227_vm6, %vm419_vm10  ;;  %vm1155_vm6 = vcmp.eq.s32.totalorder %v2969_v59, %v1071_v0  ;;  %vm931_vm10 = vcmp.eq.s32.totalorder %v2969_v59, %v863_v7  ;;  %v5463_v7 = vld [vmem:[#allocation16_spill] sm:$0xff] }
 0x231   :  { %1928 = vmatmul.mubr.f32.gmra.mrb[18].mxu1 %v1379_v25  ;;  %vm484_vm12 = vmor %vm228_vm13, %vm420_vm7  ;;  %vm5428_vm13 = vcmp.eq.s32.totalorder %v2977_v5, 141 }
 0x232   :  { %vm740_vm11 = vmor %vm484_vm12, %vm676_vm8  ;;  %vm5429_vm12 = vnez %v5247_v30 }
 0x233   :  { %vm1220_vm2 = vmor %vm5427_vm5, %vm1156_vm9  ;;  %v1528_v28 = vpop.permute.xlu1 %1527 }
 0x234   :  { %vm996_vm3 = vmor %vm740_vm11, %vm932_vm4  ;;  %vm1187_vm4 = vcmp.eq.s32.totalorder %v2969_v59, %v1119_v40 }
 0x235   :  { %vm739_vm14 = vmor %vm483_vm15, %vm675_vm0  ;;  %vm389_vm15 = vcmp.eq.s32.totalorder %v2969_v59, %v5430_v57 }
 0x236   :  { %vm1286_vm7 = vmor %vm1220_vm2, %vm5428_vm13  ;;  %vm5432_vm2 = vcmp.eq.s32.totalorder %v2977_v5, 140 }
 0x237   :  { %vm1252_vm8 = vmor %vm996_vm3, %vm1188_vm1  ;;  %v1350_v58 = vsel %vm1286_vm7, 1.0, %v2273_v52  ;;  %vm390_vm3 = vcmp.eq.s32.totalorder %v2977_v5, %v5430_v57  ;;  %vm5433_vm1 = vcmask 113664   ;;  %v869_v27 = vpop.permute.xlu1 %868  ;;  %v5481_v57 = vld [vmem:[#allocation56_spill] sm:$0xff] }
 0x238   :  { %vm1219_vm5 = vmor %vm5429_vm12, %vm1155_vm6  ;;  %v1576_v9 = vsel %vm5432_vm2, %v1448_v47, %v1350_v58  ;;  %vm421_vm6 = vcmp.eq.s32.totalorder %v2969_v59, %v5435_v4  ;;  %vm229_vm12 = vcmp.eq.s32.totalorder %v2969_v59, %v5438_v39  ;;  %v5479_v58 = vmov 0 }
 0x239   :  { %vm995_vm9 = vmor %vm739_vm14, %vm931_vm10  ;;  %2022 = vmatprep.mubr.msk.f32.mxu0 %vm5433_vm1, %v1576_v9  ;;  %v1349_v30 = vsel %vm1219_vm5, 1.0, %v2273_v52  ;;  %vm197_vm14 = vcmp.eq.s32.totalorder %v2969_v59, %v5434_v44 }
 0x23a   :  { %vm5431_vm0 = vmmov %vm5428_vm13  ;;  %1853 = vmatmul.mubr.f32.gmra.mrb[20].mxu0 %v1349_v30  ;;  %vm198_vm13 = vcmp.eq.s32.totalorder %v2977_v5, %v5434_v44  ;;  %v5483_v44 = vld [vmem:[#allocation32_spill] sm:$0xff] }
 0x23b   :  { %vm1318_vm11 = vmor %vm1252_vm8, %vm5431_vm0  ;;  %vm422_vm8 = vcmp.eq.s32.totalorder %v2977_v5, %v5435_v4  ;;  %v1077_v42 = vpop.permute.xlu1 %1076  ;;  %v5484_v4 = vld [vmem:[#allocation33_spill] sm:$0xff] }
 0x23c   :  { %vm1251_vm10 = vmor %vm995_vm9, %vm1187_vm4  ;;  %v1382_v15 = vsel %vm1318_vm11, 1.0, %v2273_v52  ;;  %vm645_vm9 = vcmp.eq.s32.totalorder %v2969_v59, %v5439_v29 }
 0x23d   :  { %vm4506_vm7 = vmor %vm197_vm14, %vm389_vm15  ;;  %vm230_vm15 = vcmp.eq.s32.totalorder %v2977_v5, %v5438_v39  ;;  %v1381_v45 = vsel %vm1251_vm10, 1.0, %v2273_v52  ;;  %vm678_vm14 = vcmp.eq.s32.totalorder %v2977_v5, %v5441_v12 }
 0x23e   :  { %vm454_vm5 = vmor %vm198_vm13, %vm390_vm3  ;;  %vm677_vm3 = vcmp.eq.s32.totalorder %v2969_v59, %v5441_v12  ;;  %v5495_v12 = vld [vmem:[#allocation62_spill] sm:$0xff] }
 0x23f   :  { %vm5440_vm4 = vmmov %vm5432_vm2  ;;  %vm646_vm2 = vcmp.eq.s32.totalorder %v2977_v5, %v5439_v29 }
 0x240   :  { %v1608_v22 = vsel %vm5440_vm4, %v1528_v28, %v1382_v15  ;;  %vm485_vm0 = vmor %vm229_vm12, %vm421_vm6  ;;  %vm902_vm12 = vcmp.eq.s32.totalorder %v2977_v5, %v3680_v61 }
 0x241   :  { %2038 = vmatprep.mubr.msk.f32.mxu1 %vm5433_vm1, %v1608_v22  ;;  %vm486_vm11 = vmor %vm230_vm15, %vm422_vm8  ;;  %vm1158_vm8 = vcmp.eq.s32.totalorder %v2977_v5, %v1074_v31  ;;  %vm934_vm15 = vcmp.eq.s32.totalorder %v2977_v5, %v4473_v13  ;;  %vm1190_vm1 = vcmp.eq.s32.totalorder %v2977_v5, %v1122_v50 }
 0x242   :  { %1933 = vmatmul.mubr.f32.gmra.mrb[20].mxu1 %v1381_v45  ;;  %vm4531_vm13 = vmor %vm4506_vm7, %vm645_vm9  ;;  %vm901_vm7 = vcmp.eq.s32.totalorder %v2969_v59, %v3680_v61  ;;  %v1453_v61 = vpop.permute.xlu1 %1452 }
 0x243   :  { %vm710_vm6 = vmor %vm454_vm5, %vm646_vm2 }
 0x244   :  { %vm4537_vm10 = vmor %vm485_vm0, %vm677_vm3  ;;  %vm1157_vm3 = vcmp.eq.s32.totalorder %v2969_v59, %v1074_v31  ;;  %v5476_v31 = vld [vmem:[#allocation18_spill] sm:$0xff] }
 0x245   :  { %v5445_v54 = vsel %vm4537_vm10, 4294967295, %v5444_v54  ;;  %vm742_vm4 = vmor %vm486_vm11, %vm678_vm14  ;;  %vm933_vm11 = vcmp.eq.s32.totalorder %v2969_v59, %v4473_v13  ;;  %vm5446_vm14 = vcmp.eq.s32.totalorder %v2977_v5, 141  ;;  %v5475_v13 = vld [vmem:[#allocation43_spill] sm:$0xff] }
 0x246   :  { %vm966_vm9 = vmor %vm710_vm6, %vm902_vm12 }
 0x247   :  { %vm1222_vm5 = vmor %vm966_vm9, %vm1158_vm8  ;;  %vm5447_vm8 = vnez %v5445_v54  ;;  %v1533_v49 = vpop.permute.xlu1 %1532 }
 0x248   :  { %vm998_vm2 = vmor %vm742_vm4, %vm934_vm15  ;;  %vm1189_vm4 = vcmp.eq.s32.totalorder %v2969_v59, %v1122_v50 }
 0x249   :  { %vm965_vm0 = vmor %vm4531_vm13, %vm901_vm7  ;;  %vm5449_vm7 = vcmp.eq.s32.totalorder %v2977_v5, 140 }
 0x24a   :  { %vm1288_vm10 = vmor %vm1222_vm5, %vm5446_vm14  ;;  %vm5450_vm5 = vcmask 113664   ;;  %v1884_v18 = vpop.f32.mrb[0].mxu1 }
 0x24b   :  { %vm1254_vm6 = vmor %vm998_vm2, %vm1190_vm1  ;;  %v1352_v34 = vsel %vm1288_vm10, 1.0, %v2273_v52  ;;  %vm231_vm10 = vcmp.eq.s32.totalorder %v2969_v59, %v5453_v32  ;;  %1979 = vst [vmem:[#allocation2 + $0x80] sm:$0xff] %v1884_v18  ;;  %v1886_v40 = vpop.f32.mrb[1].mxu1 }
 0x24c   :  { %vm1221_vm12 = vmor %vm965_vm0, %vm1157_vm3  ;;  %v1578_v16 = vsel %vm5449_vm7, %v1453_v61, %v1352_v34  ;;  %vm423_vm3 = vcmp.eq.s32.totalorder %v2969_v59, %v5454_v11  ;;  %v4579_v56 = vpop.permute.xlu1 %871  ;;  %v5502_v61 = vld [vmem:[#allocation70_spill] sm:$0xff] }
 0x24d   :  { %vm997_vm9 = vmor %vm5447_vm8, %vm933_vm11  ;;  %2023 = vmatprep.mubr.msk.f32.mxu0 %vm5450_vm5, %v1578_v16  ;;  %v1351_v63 = vsel %vm1221_vm12, 1.0, %v2273_v52  ;;  %vm232_vm11 = vcmp.eq.s32.totalorder %v2977_v5, %v5453_v32  ;;  %vm1160_vm8 = vcmp.eq.s32.totalorder %v2977_v5, %v1077_v42  ;;  %v1804_v9 = vpop.f32.mrb[0].mxu0 }
 0x24e   :  { %vm5448_vm13 = vmmov %vm5446_vm14  ;;  %1858 = vmatmul.mubr.f32.gmra.mrb[22].mxu0 %v1351_v63  ;;  %vm424_vm14 = vcmp.eq.s32.totalorder %v2977_v5, %v5454_v11  ;;  %1963 = vst [vmem:[#allocation2] sm:$0xff] %v1804_v9  ;;  %v1806_v30 = vpop.f32.mrb[1].mxu0  ;;  %v5503_v63 = vmov 0 }
 0x24f   :  { %vm1320_vm15 = vmor %vm1254_vm6, %vm5448_vm13  ;;  %vm680_vm6 = vcmp.eq.s32.totalorder %v2977_v5, %v5455_v8  ;;  %vm679_vm13 = vcmp.eq.s32.totalorder %v2969_v59, %v5455_v8 }
 0x250   :  { %vm1253_vm2 = vmor %vm997_vm9, %vm1189_vm4  ;;  %v1384_v26 = vsel %vm1320_vm15, 1.0, %v2273_v52  ;;  %vm936_vm4 = vcmp.eq.s32.totalorder %v2977_v5, %v869_v27 }
 0x251   :  { %vm5451_vm1 = vmmov %vm5449_vm7  ;;  %v1383_v48 = vsel %vm1253_vm2, 1.0, %v2273_v52  ;;  %vm5456_vm7 = vnez %v5276_v53  ;;  %v4588_v14 = vpop.permute.xlu1 %1079 }
 0x252   :  { %v1610_v62 = vsel %vm5451_vm1, %v1533_v49, %v1384_v26  ;;  %vm5452_vm0 = vmmov %vm5450_vm5  ;;  %vm1192_vm1 = vcmp.eq.s32.totalorder %v2977_v5, %v1125_v38 }
 0x253   :  { %2039 = vmatprep.mubr.msk.f32.mxu1 %vm5452_vm0, %v1610_v62  ;;  %vm487_vm12 = vmor %vm231_vm10, %vm423_vm3  ;;  %vm1159_vm10 = vcmp.eq.s32.totalorder %v2969_v59, %v1077_v42  ;;  %vm935_vm3 = vcmp.eq.s32.totalorder %v2969_v59, %v869_v27  ;;  %v5508_v62 = vld [vmem:[#allocation72_spill] sm:$0xff] }
 0x254   :  { %1938 = vmatmul.mubr.f32.gmra.mrb[22].mxu1 %v1383_v48  ;;  %vm488_vm9 = vmor %vm232_vm11, %vm424_vm14  ;;  %vm5457_vm11 = vcmp.eq.s32.totalorder %v2977_v5, 141 }
 0x255   :  { %vm744_vm15 = vmor %vm488_vm9, %vm680_vm6  ;;  %vm5458_vm9 = vnez %v5271_v33 }
 0x256   :  { %vm1224_vm5 = vmor %vm5456_vm7, %vm1160_vm8  ;;  %v1458_v53 = vpop.permute.xlu1 %1457 }
 0x257   :  { %vm1000_vm2 = vmor %vm744_vm15, %vm936_vm4  ;;  %vm1191_vm4 = vcmp.eq.s32.totalorder %v2969_v59, %v1125_v38  ;;  %v1131_v38 = vpop.permute.xlu0 %1130 }
 0x258   :  { %vm743_vm0 = vmor %vm487_vm12, %vm679_vm13  ;;  %vm393_vm12 = vcmp.eq.s32.totalorder %v2969_v59, %v5459_v41  ;;  %v1889_v27 = vpop.f32.mrb[2].mxu1 }
 0x259   :  { %vm1290_vm14 = vmor %vm1224_vm5, %vm5457_vm11  ;;  %vm5461_vm5 = vcmp.eq.s32.totalorder %v2977_v5, 140  ;;  %1980 = vst [vmem:[#allocation2 + $0x88] sm:$0xff] %v1889_v27  ;;  %v1891_v50 = vpop.f32.mrb[3].mxu1 }
 0x25a   :  { %vm1256_vm6 = vmor %vm1000_vm2, %vm1192_vm1  ;;  %v1354_v46 = vsel %vm1290_vm14, 1.0, %v2273_v52  ;;  %vm394_vm2 = vcmp.eq.s32.totalorder %v2977_v5, %v5459_v41  ;;  %vm5462_vm1 = vcmask 113664   ;;  %v1538_v0 = vpop.permute.xlu1 %1537  ;;  %v5526_v41 = vmov 0 }
 0x25b   :  { %vm1223_vm7 = vmor %vm5458_vm9, %vm1159_vm10  ;;  %v1580_v24 = vsel %vm5461_vm5, %v1458_v53, %v1354_v46  ;;  %vm425_vm10 = vcmp.eq.s32.totalorder %v2969_v59, %v5464_v1  ;;  %vm233_vm9 = vcmp.eq.s32.totalorder %v2969_v59, %v5467_v21  ;;  %v5518_v46 = vmov 0 }
 0x25c   :  { %vm999_vm8 = vmor %vm743_vm0, %vm935_vm3  ;;  %2024 = vmatprep.mubr.msk.f32.mxu0 %vm5462_vm1, %v1580_v24  ;;  %v1353_v33 = vsel %vm1223_vm7, 1.0, %v2273_v52  ;;  %vm201_vm0 = vcmp.eq.s32.totalorder %v2969_v59, %v5463_v7 }
 0x25d   :  { %vm5460_vm13 = vmmov %vm5457_vm11  ;;  %1863 = vmatmul.mubr.f32.gmra.mrb[24].mxu0 %v1353_v33  ;;  %vm202_vm11 = vcmp.eq.s32.totalorder %v2977_v5, %v5463_v7  ;;  %v1134_v33 = vpop.permute.xlu0 %1133 }
 0x25e   :  { %vm1322_vm15 = vmor %vm1256_vm6, %vm5460_vm13  ;;  %vm426_vm6 = vcmp.eq.s32.totalorder %v2977_v5, %v5464_v1 }
 0x25f   :  { %vm1255_vm3 = vmor %vm999_vm8, %vm1191_vm4  ;;  %v1386_v20 = vsel %vm1322_vm15, 1.0, %v2273_v52  ;;  %vm649_vm8 = vcmp.eq.s32.totalorder %v2969_v59, %v5468_v55  ;;  %v4645_v25 = vpop.permute.xlu1 %874 }
 0x260   :  { %vm4614_vm14 = vmor %vm201_vm0, %vm393_vm12  ;;  %vm234_vm12 = vcmp.eq.s32.totalorder %v2977_v5, %v5467_v21  ;;  %v1385_v35 = vsel %vm1255_vm3, 1.0, %v2273_v52  ;;  %vm682_vm0 = vcmp.eq.s32.totalorder %v2977_v5, %v5470_v6  ;;  %v1809_v11 = vpop.f32.mrb[2].mxu0 }
 0x261   :  { %vm458_vm7 = vmor %vm202_vm11, %vm394_vm2  ;;  %vm681_vm2 = vcmp.eq.s32.totalorder %v2969_v59, %v5470_v6  ;;  %1964 = vst [vmem:[#allocation2 + $0x8] sm:$0xff] %v1809_v11  ;;  %v1811_v8 = vpop.f32.mrb[3].mxu0  ;;  %v1473_v36 = vpop.permute.xlu0 %1472 }
 0x262   :  { %vm5469_vm4 = vmmov %vm5461_vm5  ;;  %vm650_vm5 = vcmp.eq.s32.totalorder %v2977_v5, %v5468_v55 }
 0x263   :  { %v1612_v43 = vsel %vm5469_vm4, %v1538_v0, %v1386_v20  ;;  %vm489_vm13 = vmor %vm233_vm9, %vm425_vm10  ;;  %vm906_vm9 = vcmp.eq.s32.totalorder %v2977_v5, %v3783_v60 }
 0x264   :  { %2040 = vmatprep.mubr.msk.f32.mxu1 %vm5462_vm1, %v1612_v43  ;;  %vm490_vm15 = vmor %vm234_vm12, %vm426_vm6  ;;  %vm1162_vm6 = vcmp.eq.s32.totalorder %v2977_v5, %v4588_v14  ;;  %vm205_vm1 = vcmp.eq.s32.totalorder %v2969_v59, %v5476_v31  ;;  %v4664_v47 = vpop.permute.xlu1 %1082 }
 0x265   :  { %1943 = vmatmul.mubr.f32.gmra.mrb[24].mxu1 %v1385_v35  ;;  %vm4639_vm11 = vmor %vm4614_vm14, %vm649_vm8  ;;  %vm938_vm14 = vcmp.eq.s32.totalorder %v2977_v5, %v4579_v56  ;;  %vm905_vm8 = vcmp.eq.s32.totalorder %v2969_v59, %v3783_v60 }
 0x266   :  { %vm714_vm10 = vmor %vm458_vm7, %vm650_vm5  ;;  %vm397_vm7 = vcmp.eq.s32.totalorder %v2969_v59, %v5475_v13 }
 0x267   :  { %vm4647_vm3 = vmor %vm489_vm13, %vm681_vm2  ;;  %vm398_vm13 = vcmp.eq.s32.totalorder %v2977_v5, %v5475_v13  ;;  %vm1194_vm2 = vcmp.eq.s32.totalorder %v2977_v5, %v1128_v3 }
 0x268   :  { %v5474_v23 = vsel %vm4647_vm3, 4294967295, %v5473_v23  ;;  %vm746_vm4 = vmor %vm490_vm15, %vm682_vm0  ;;  %vm206_vm0 = vcmp.eq.s32.totalorder %v2977_v5, %v5476_v31 }
 0x269   :  { %vm970_vm12 = vmor %vm714_vm10, %vm906_vm9  ;;  %vm1161_vm9 = vcmp.eq.s32.totalorder %v2969_v59, %v4588_v14  ;;  %v1463_v39 = vpop.permute.xlu1 %1462 }
 0x26a   :  { %vm1226_vm5 = vmor %vm970_vm12, %vm1162_vm6 }
 0x26b   :  { %vm1002_vm15 = vmor %vm746_vm4, %vm938_vm14  ;;  %vm430_vm4 = vcmp.eq.s32.totalorder %v2977_v5, %v5481_v57  ;;  %vm937_vm14 = vcmp.eq.s32.totalorder %v2969_v59, %v4579_v56  ;;  %v5513_v56 = vmov 0 }
 0x26c   :  { %vm4668_vm3 = vmor %vm205_vm1, %vm397_vm7  ;;  %vm5482_vm7 = vcmp.eq.s32.totalorder %v2977_v5, 141 }
 0x26d   :  { %vm969_vm10 = vmor %vm4639_vm11, %vm905_vm8  ;;  %vm238_vm11 = vcmp.eq.s32.totalorder %v2977_v5, %v5483_v44  ;;  %vm235_vm8 = vcmp.eq.s32.totalorder %v2969_v59, %v5484_v4 }
 0x26e   :  { %vm4676_vm6 = vmor %vm206_vm0, %vm398_vm13  ;;  %vm427_vm13 = vcmp.eq.s32.totalorder %v2969_v59, %v5485_v19 }
 0x26f   :  { %v5480_v58 = vsel %vm4676_vm6, 4294967295, %v5479_v58  ;;  %vm1292_vm12 = vmor %vm1226_vm5, %vm5482_vm7  ;;  %vm5488_vm5 = vnez %v5474_v23 }
 0x270   :  { %vm1258_vm1 = vmor %vm1002_vm15, %vm1194_vm2  ;;  %vm1193_vm15 = vcmp.eq.s32.totalorder %v2969_v59, %v1128_v3  ;;  %v1356_v29 = vsel %vm1292_vm12, 1.0, %v2273_v52  ;;  %vm653_vm12 = vcmp.eq.s32.totalorder %v2969_v59, %v5495_v12  ;;  %vm5498_vm2 = vcmask 113664  }
 0x271   :  { %vm1225_vm0 = vmor %vm969_vm10, %vm1161_vm9  ;;  %vm428_vm10 = vcmp.eq.s32.totalorder %v2977_v5, %v5485_v19  ;;  %vm5491_vm9 = vcmp.eq.s32.totalorder %v2977_v5, 141 }
 0x272   :  { %vm4692_vm6 = vmor %vm238_vm11, %vm430_vm4  ;;  %vm429_vm11 = vcmp.eq.s32.totalorder %v2969_v59, %v5481_v57  ;;  %v1355_v54 = vsel %vm1225_vm0, 1.0, %v2273_v52  ;;  %v1543_v34 = vpop.permute.xlu1 %1542 }
 0x273   :  { %vm4698_vm7 = vmor %vm5488_vm5, %vm937_vm14  ;;  %vm5494_vm14 = vcmp.eq.s32.totalorder %v2977_v5, 140 }
 0x274   :  { %vm4710_vm4 = vmor %vm1258_vm1, %vm5491_vm9  ;;  %v1582_v45 = vsel %vm5494_vm14, %v1463_v39, %v1356_v29  ;;  %vm654_vm1 = vcmp.eq.s32.totalorder %v2977_v5, %v5495_v12 }
 0x275   :  { %vm4720_vm5 = vmor %vm235_vm8, %vm427_vm13  ;;  %2025 = vmatprep.mubr.msk.f32.mxu0 %vm5498_vm2, %v1582_v45  ;;  %vm237_vm8 = vcmp.eq.s32.totalorder %v2969_v59, %v5483_v44  ;;  %vm5499_vm13 = vcmp.eq.s32.totalorder %v2977_v5, %v5484_v4  ;;  %vm683_vm2 = vcmp.eq.s32.totalorder %v2969_v59, %v5502_v61  ;;  %v1388_v16 = vsel %vm4710_vm4, 1.0, %v2273_v52 }
 0x276   :  { %1868 = vmatmul.mubr.f32.gmra.mrb[26].mxu0 %v1355_v54  ;;  %vm1257_vm9 = vmor %vm4698_vm7, %vm1193_vm15  ;;  %vm684_vm15 = vcmp.eq.s32.totalorder %v2977_v5, %v5502_v61 }
 0x277   :  { %vm4740_vm0 = vmor %vm5499_vm13, %vm428_vm10  ;;  %vm910_vm13 = vcmp.eq.s32.totalorder %v2977_v5, %v3987_v2  ;;  %v1387_v48 = vsel %vm1257_vm9, 1.0, %v2273_v52  ;;  %v878_v14 = vpop.permute.xlu1 %877 }
 0x278   :  { %vm4752_vm7 = vmor %vm237_vm8, %vm429_vm11  ;;  %vm5509_vm11 = vnez %v5480_v58 }
 0x279   :  { %v5504_v63 = vsel %vm4752_vm7, 4294967295, %v5503_v63  ;;  %vm4763_vm10 = vmor %vm4668_vm3, %vm653_vm12  ;;  %vm5510_vm7 = vcmask 113664   ;;  %vm940_vm12 = vcmp.eq.s32.totalorder %v2977_v5, %v4645_v25 }
 0x27a   :  { %vm5507_vm4 = vmmov %vm5494_vm14  ;;  %vm686_vm14 = vcmp.eq.s32.totalorder %v2977_v5, %v5508_v62 }
 0x27b   :  { %v1614_v26 = vsel %vm5507_vm4, %v1543_v34, %v1388_v16  ;;  %vm718_vm8 = vmor %vm5509_vm11, %vm654_vm1  ;;  %vm1164_vm4 = vcmp.eq.s32.totalorder %v2977_v5, %v4664_v47  ;;  %vm5517_vm11 = vnez %v5288_v10 }
 0x27c   :  { %2041 = vmatprep.mubr.msk.f32.mxu1 %vm5510_vm7, %v1614_v26  ;;  %vm4782_vm3 = vmor %vm4720_vm5, %vm683_vm2  ;;  %vm939_vm5 = vcmp.eq.s32.totalorder %v2969_v59, %v4645_v25  ;;  %vm909_vm2 = vcmp.eq.s32.totalorder %v2969_v59, %v3987_v2  ;;  %v5520_v2 = vmov 0  ;;  %v1086_v24 = vpop.permute.xlu1 %1085  ;;  %v1814_v23 = vpop.f32.mrb[4].mxu0 }
 0x27d   :  { %1948 = vmatmul.mubr.f32.gmra.mrb[26].mxu1 %v1387_v48  ;;  %vm748_vm1 = vmor %vm4740_vm0, %vm684_vm15  ;;  %vm685_vm15 = vcmp.eq.s32.totalorder %v2969_v59, %v5508_v62  ;;  %1965 = vst [vmem:[#allocation2 + $0x10] sm:$0xff] %v1814_v23  ;;  %v1816_v18 = vpop.f32.mrb[5].mxu0 }
 0x27e   :  { %vm4792_vm9 = vmor %vm718_vm8, %vm910_vm13  ;;  %vm1196_vm13 = vcmp.eq.s32.totalorder %v2977_v5, %v1131_v38 }
 0x27f   :  { %v5514_v56 = vsel %vm4792_vm9, 4294967295, %v5513_v56  ;;  %vm4803_vm0 = vmor %vm4692_vm6, %vm686_vm14  ;;  %vm1163_vm6 = vcmp.eq.s32.totalorder %v2969_v59, %v4664_v47 }
 0x280   :  { %vm1004_vm7 = vmor %vm748_vm1, %vm940_vm12  ;;  %vm5522_vm1 = vcmp.eq.s32.totalorder %v2977_v5, 141  ;;  %v1819_v60 = vpop.f32.mrb[6].mxu0  ;;  %v1894_v58 = vpop.f32.mrb[4].mxu1 }
 0x281   :  { %vm1228_vm8 = vmor %vm5517_vm11, %vm1164_vm4  ;;  %v1468_v0 = vpop.permute.xlu1 %1467  ;;  %1966 = vst [vmem:[#allocation2 + $0x18] sm:$0xff] %v1819_v60  ;;  %v1821_v57 = vpop.f32.mrb[7].mxu0 }
 0x282   :  { %vm4816_vm9 = vmor %vm4782_vm3, %vm939_vm5  ;;  %vm5525_vm3 = vnez %v5504_v63  ;;  %1981 = vst [vmem:[#allocation2 + $0x90] sm:$0xff] %v1894_v58  ;;  %v1896_v9 = vpop.f32.mrb[5].mxu1 }
 0x283   :  { %v5519_v46 = vsel %vm4816_vm9, 4294967295, %v5518_v46  ;;  %vm4824_vm14 = vmor %vm4763_vm10, %vm909_vm2  ;;  %vm942_vm10 = vcmp.eq.s32.totalorder %v2977_v5, %v878_v14  ;;  %vm1166_vm2 = vcmp.eq.s32.totalorder %v2977_v5, %v1086_v24 }
 0x284   :  { %v5521_v2 = vsel %vm4824_vm14, 4294967295, %v5520_v2  ;;  %vm1260_vm12 = vmor %vm1004_vm7, %vm1196_vm13  ;;  %vm5528_vm7 = vnez %v5285_v17 }
 0x285   :  { %vm4830_vm4 = vmor %vm1228_vm8, %vm5522_vm1  ;;  %vm5531_vm8 = vnez %v5514_v56  ;;  %v1548_v51 = vpop.permute.xlu1 %1547 }
 0x286   :  { %vm4836_vm5 = vmor %vm5525_vm3, %vm685_vm15  ;;  %v1358_v20 = vsel %vm4830_vm4, 1.0, %v2273_v52 }
 0x287   :  { %v5527_v41 = vsel %vm4836_vm5, 4294967295, %v5526_v41  ;;  %vm4844_vm11 = vmor %vm5528_vm7, %vm1163_vm6  ;;  %vm1195_vm5 = vcmp.eq.s32.totalorder %v2969_v59, %v1131_v38  ;;  %vm1165_vm6 = vcmp.eq.s32.totalorder %v2969_v59, %v1086_v24 }
 0x288   :  { %vm1230_vm13 = vmor %vm5531_vm8, %vm1166_vm2  ;;  %vm5536_vm2 = vcmp.eq.s32.totalorder %v2977_v5, 140  ;;  %vm5540_vm8 = vcmask 113664   ;;  %v1357_v43 = vsel %vm4844_vm11, 1.0, %v2273_v52 }
 0x289   :  { %vm5532_vm15 = vmmov %vm5522_vm1  ;;  %v1584_v21 = vsel %vm5536_vm2, %v1468_v0, %v1358_v20  ;;  %v1553_v31 = vpop.permute.xlu1 %1552 }
 0x28a   :  { %vm1296_vm1 = vmor %vm1230_vm13, %vm5532_vm15  ;;  %2026 = vmatprep.mubr.msk.f32.mxu0 %vm5540_vm8, %v1584_v21  ;;  %vm5542_vm13 = vnez %v5521_v2 }
 0x28b   :  { %vm1006_vm3 = vmor %vm4803_vm0, %vm942_vm10  ;;  %v1360_v17 = vsel %vm1296_vm1, 1.0, %v2273_v52  ;;  %vm1198_vm0 = vcmp.eq.s32.totalorder %v2977_v5, %v1134_v33  ;;  %vm941_vm10 = vcmp.eq.s32.totalorder %v2969_v59, %v878_v14  ;;  %1873 = vmatmul.mubr.f32.gmra.mrb[28].mxu0 %v1357_v43  ;;  %vm5543_vm1 = vnez %v5527_v41 }
 0x28c   :  { %vm5533_vm14 = vmmov %vm5532_vm15 }
 0x28d   :  { %vm4857_vm9 = vmor %vm1260_vm12, %vm5533_vm14  ;;  %vm5537_vm14 = vnez %v5519_v46  ;;  %v1899_v44 = vpop.f32.mrb[6].mxu1 }
 0x28e   :  { %vm4872_vm12 = vmor %vm5537_vm14, %vm1195_vm5  ;;  %v1390_v25 = vsel %vm4857_vm9, 1.0, %v2273_v52  ;;  %1982 = vst [vmem:[#allocation2 + $0x98] sm:$0xff] %v1899_v44  ;;  %v1901_v4 = vpop.f32.mrb[7].mxu1 }
 0x28f   :  { %vm1262_vm7 = vmor %vm1006_vm3, %vm1198_vm0  ;;  %vm5547_vm3 = vcmp.eq.s32.totalorder %v2977_v5, 141  ;;  %v1616_v3 = vsel %vm5536_vm2, %v1548_v51, %v1390_v25  ;;  %v1389_v40 = vsel %vm4872_vm12, 1.0, %v2273_v52 }
 0x290   :  { %vm5541_vm4 = vmmov %vm5536_vm2 }
 0x291   :  { %v1586_v35 = vsel %vm5541_vm4, %v1473_v36, %v1360_v17  ;;  %vm1229_vm15 = vmor %vm5542_vm13, %vm1165_vm6  ;;  %vm1197_vm6 = vcmp.eq.s32.totalorder %v2969_v59, %v1134_v33 }
 0x292   :  { %vm4886_vm5 = vmor %vm5543_vm1, %vm941_vm10  ;;  %v1359_v13 = vsel %vm1229_vm15, 1.0, %v2273_v52 }
 0x293   :  { %vm5546_vm11 = vmmov %vm5540_vm8 }
 0x294   :  { %2027 = vmatprep.mubr.msk.f32.mxu0 %vm5546_vm11, %v1586_v35  ;;  %vm1328_vm0 = vmor %vm1262_vm7, %vm5547_vm3 }
 0x295   :  { %vm5548_vm10 = vmmov %vm5540_vm8  ;;  %1878 = vmatmul.mubr.f32.gmra.mrb[30].mxu0 %v1359_v13  ;;  %v1392_v47 = vsel %vm1328_vm0, 1.0, %v2273_v52  ;;  %v1904_v19 = vpop.f32.mrb[8].mxu1 }
 0x296   :  { %2042 = vmatprep.mubr.msk.f32.mxu1 %vm5548_vm10, %v1616_v3  ;;  %vm1261_vm9 = vmor %vm4886_vm5, %vm1197_vm6  ;;  %1983 = vst [vmem:[#allocation2 + $0xa0] sm:$0xff] %v1904_v19  ;;  %v1906_v28 = vpop.f32.mrb[9].mxu1 }
 0x297   :  { %1953 = vmatmul.mubr.f32.gmra.mrb[28].mxu1 %v1389_v40  ;;  %vm5549_vm14 = vmmov %vm5536_vm2  ;;  %v1391_v30 = vsel %vm1261_vm9, 1.0, %v2273_v52 }
 0x298   :  { %v1618_v59 = vsel %vm5549_vm14, %v1553_v31, %v1392_v47  ;;  %vm5550_vm7 = vmmov %vm5540_vm8 }
 0x299   :  { %2043 = vmatprep.mubr.msk.f32.mxu1 %vm5550_vm7, %v1618_v59 }
 0x29b   :  { %1958 = vmatmul.mubr.f32.gmra.mrb[30].mxu1 %v1391_v30 }
 0x2a5   :  { %v1824_v15 = vpop.f32.mrb[8].mxu0 }
 0x2a6   :  { %1967 = vst [vmem:[#allocation2 + $0x20] sm:$0xff] %v1824_v15  ;;  %v1826_v5 = vpop.f32.mrb[9].mxu0 }
 0x2b6   :  { %v1829_v39 = vpop.f32.mrb[10].mxu0 }
 0x2b7   :  { %1968 = vst [vmem:[#allocation2 + $0x28] sm:$0xff] %v1829_v39  ;;  %v1831_v29 = vpop.f32.mrb[11].mxu0 }
 0x2bd   :  { %v1834_v22 = vpop.f32.mrb[12].mxu0 }
 0x2be   :  { %1969 = vst [vmem:[#allocation2 + $0x30] sm:$0xff] %v1834_v22  ;;  %v1836_v12 = vpop.f32.mrb[13].mxu0 }
 0x2c1   :  { %v1909_v45 = vpop.f32.mrb[10].mxu1 }
 0x2c2   :  { %1984 = vst [vmem:[#allocation2 + $0xa8] sm:$0xff] %v1909_v45  ;;  %v1911_v37 = vpop.f32.mrb[11].mxu1 }
 0x2cd   :  { %v1914_v52 = vpop.f32.mrb[12].mxu1 }
 0x2ce   :  { %1985 = vst [vmem:[#allocation2 + $0xb0] sm:$0xff] %v1914_v52  ;;  %v1916_v27 = vpop.f32.mrb[13].mxu1 }
 0x2d3   :  { %v1919_v54 = vpop.f32.mrb[14].mxu1 }
 0x2d4   :  { %1986 = vst [vmem:[#allocation2 + $0xb8] sm:$0xff] %v1919_v54  ;;  %v1921_v50 = vpop.f32.mrb[15].mxu1 }
 0x2dc   :  { %v1839_v42 = vpop.f32.mrb[14].mxu0 }
 0x2dd   :  { %1970 = vst [vmem:[#allocation2 + $0x38] sm:$0xff] %v1839_v42  ;;  %v1841_v61 = vpop.f32.mrb[15].mxu0 }
 0x2eb   :  { %v1844_v34 = vpop.f32.mrb[16].mxu0 }
 0x2ec   :  { %1971 = vst [vmem:[#allocation2 + $0x40] sm:$0xff] %v1844_v34  ;;  %v1846_v16 = vpop.f32.mrb[17].mxu0 }
 0x2f2   :  { %v1924_v63 = vpop.f32.mrb[16].mxu1 }
 0x2f3   :  { %1987 = vst [vmem:[#allocation2 + $0xc0] sm:$0xff] %v1924_v63  ;;  %v1926_v49 = vpop.f32.mrb[17].mxu1 }
 0x2fe   :  { %v1849_v26 = vpop.f32.mrb[18].mxu0 }
 0x2ff   :  { %1972 = vst [vmem:[#allocation2 + $0x48] sm:$0xff] %v1849_v26  ;;  %v1851_v62 = vpop.f32.mrb[19].mxu0 }
 0x304   :  { %v1929_v48 = vpop.f32.mrb[18].mxu1 }
 0x305   :  { %1988 = vst [vmem:[#allocation2 + $0xc8] sm:$0xff] %v1929_v48  ;;  %v1931_v32 = vpop.f32.mrb[19].mxu1 }
 0x30d   :  { %v1854_v11 = vpop.f32.mrb[20].mxu0 }
 0x30e   :  { %1973 = vst [vmem:[#allocation2 + $0x50] sm:$0xff] %v1854_v11  ;;  %v1856_v8 = vpop.f32.mrb[21].mxu0 }
 0x315   :  { %v1934_v56 = vpop.f32.mrb[20].mxu1 }
 0x316   :  { %1989 = vst [vmem:[#allocation2 + $0xd0] sm:$0xff] %v1934_v56  ;;  %v1936_v38 = vpop.f32.mrb[21].mxu1 }
 0x321   :  { %v1859_v14 = vpop.f32.mrb[22].mxu0 }
 0x322   :  { %1974 = vst [vmem:[#allocation2 + $0x58] sm:$0xff] %v1859_v14  ;;  %v1861_v53 = vpop.f32.mrb[23].mxu0 }
 0x327   :  { %v1939_v46 = vpop.f32.mrb[22].mxu1 }
 0x328   :  { %1990 = vst [vmem:[#allocation2 + $0xd8] sm:$0xff] %v1939_v46  ;;  %v1941_v2 = vpop.f32.mrb[23].mxu1 }
 0x330   :  { %v1864_v10 = vpop.f32.mrb[24].mxu0 }
 0x331   :  { %1975 = vst [vmem:[#allocation2 + $0x60] sm:$0xff] %v1864_v10  ;;  %v1866_v41 = vpop.f32.mrb[25].mxu0 }
 0x338   :  { %v1944_v24 = vpop.f32.mrb[24].mxu1 }
 0x339   :  { %1991 = vst [vmem:[#allocation2 + $0xe0] sm:$0xff] %v1944_v24  ;;  %v1946_v33 = vpop.f32.mrb[25].mxu1 }
 0x349   :  { %v1869_v7 = vpop.f32.mrb[26].mxu0 }
 0x34a   :  { %1976 = vst [vmem:[#allocation2 + $0x68] sm:$0xff] %v1869_v7  ;;  %v1871_v1 = vpop.f32.mrb[27].mxu0 }
 0x350   :  { %v1949_v17 = vpop.f32.mrb[26].mxu1 }
 0x351   :  { %1992 = vst [vmem:[#allocation2 + $0xe8] sm:$0xff] %v1949_v17  ;;  %v1951_v36 = vpop.f32.mrb[27].mxu1 }
 0x35e   :  { %v1874_v0 = vpop.f32.mrb[28].mxu0 }
 0x35f   :  { %1977 = vst [vmem:[#allocation2 + $0x70] sm:$0xff] %v1874_v0  ;;  %v1876_v20 = vpop.f32.mrb[29].mxu0 }
 0x368   :  { %v1879_v21 = vpop.f32.mrb[30].mxu0 }
 0x369   :  { %1978 = vst [vmem:[#allocation2 + $0x78] sm:$0xff] %v1879_v21  ;;  %v1881_v43 = vpop.f32.mrb[31].mxu0 }
 0x36a   :  { %v1954_v55 = vpop.f32.mrb[28].mxu1 }
 0x36b   :  { %1993 = vst [vmem:[#allocation2 + $0xf0] sm:$0xff] %v1954_v55  ;;  %v1956_v35 = vpop.f32.mrb[29].mxu1 }
 0x36e   :  { %v1959_v6 = vpop.f32.mrb[30].mxu1 }
 0x36f   :  { %1994 = vst [vmem:[#allocation2 + $0xf8] sm:$0xff] %v1959_v6  ;;  %v1961_v51 = vpop.f32.mrb[31].mxu1 }
 0x370   :  { %2252 = shalt.err (!%p2249_p4)
}
 0x371   :  { %s2253_s9 = scalar_lea.hbm %s4925_s2, 4096 }
 0x372   :  { %p2254_p5 = scmp.ne.s32.totalorder %s4925_s2, %s2253_s9  ;;  %p2257_p6 = scmp.lt.u32.totalorder %s2253_s9, %s4925_s2 }
 0x374   :  { %p2259_p7 = pnand %p2257_p6, %p2254_p5 }
 0x376   :  { %2262 = shalt.err (!%p2259_p7)
}
 0x377   :  { %s2275_s14 = smov 128   ;;  %s2276_s15 = smov 8  }
 0x378   :  { %2006 = dma.vmem_to_hbm [thread:$0]  %s2001_s5, 4096, %s4925_s2, [#allocation3], %s2275_s14, %s2275_s14, %s2276_s15  }
 0x379   :  { %2263 = dma.done.wait [#allocation3], 4096  }
 0x37a   :  { %2264 = vsyncadd [#allocation3], 4294963200 }
 0x37b   :  { %2010 = vsyncpa [#allocation3], 1 }

</bundles_post_ra>
